<compile_context>
chip_gen: v6e
topology: v6e:2x2x1
jax: 0.10.0
libtpu: 0.0.40
codegen_flags: <defaults>
</compile_context>

<pallas_src>
import numpy as np
import jax
import jax.numpy as jnp
from jax.experimental import pallas as pl
from jax.experimental.pallas import tpu as pltpu


def _round_up(x, m):
    return ((x + m - 1) // m) * m


def critic_kernel(sa_ref, w_in_ref, w2h_ref, aux_ref, b3_ref, out_ref):
    """One batch tile; the batch lives on the lane (minor) axis.

    sa_ref  : (in_s + in_a, tm)          bf16  streamed  [state.T ; action.T]
    w_in_ref: (fc1 + fc2p, in_s + in_a)  bf16  resident  block-diag [W1 ; W2a]
    w2h_ref : (fc2p, fc1)                bf16  resident  h1-part of W2
    aux_ref : (3*fcm, 1)                 f32   resident  [b1 ; b2 ; w3] columns
    b3_ref  : (1, 1)                     f32   SMEM scalar
    out_ref : (1, tm)                    f32   q, batch along lanes (lane-dense)
    """
    fc2p, fc1 = w2h_ref.shape
    fcm = aux_ref.shape[0] // 3

    # Fused fc1 + action-part of fc2: one MXU pass over the block-diagonal weight.
    #   xw[:fc1]  = W1  @ state.T
    #   xw[fc1:]  = W2a @ action.T
    xw = jnp.dot(w_in_ref[...], sa_ref[...], preferred_element_type=jnp.float32)

    b1 = aux_ref[0:fc1, :]                       # (fc1, 1)
    b2 = aux_ref[fcm:fcm + fc2p, :]              # (fc2p, 1)
    w3 = aux_ref[2 * fcm:2 * fcm + fc2p, :]      # (fc2p, 1)

    # fc1 epilogue: bias + ReLU; emit bf16 directly (no f32 h1 round-trip).
    h1 = jnp.maximum(xw[:fc1, :] + b1, 0.0).astype(jnp.bfloat16)

    # fc2: h1-part on the MXU; action-part already computed in xw[fc1:].
    h2 = jnp.dot(w2h_ref[...], h1, preferred_element_type=jnp.float32)
    h2 = jnp.maximum(h2 + xw[fc1:, :] + b2, 0.0)

    # fc3 (N=1): VPU multiply + sublane reduce -> naturally lane-dense (1, tm).
    q = jnp.sum(h2 * w3, axis=0, keepdims=True) + b3_ref[0, 0]
    out_ref[...] = q.astype(out_ref.dtype)


def critic_forward(state, action, kernel_params, block_b=1024):
    """state (B, 2*state_size) f32, action (B, 2*action_size) f32 -> (B, 1) f32."""
    w_in_t, w2h_t, aux, b3 = kernel_params
    B = state.shape[0]
    in_dim = state.shape[1] + action.shape[1]
    assert w_in_t.shape[1] == in_dim

    # Batch is the lane axis -> tile must be a multiple of 128.  Big tiles
    # amortize the ~0.35 us/step pipeline overhead (per-step footprint at
    # tm=1024 is only a few MiB, far under every generation's VMEM); if block_b
    # is raised past ~2048, also pass vmem_limit_bytes via CompilerParams.
    b128 = _round_up(B, 128)
    tm = min(_round_up(block_b, 128), b128)
    # v7x: when everything would fit in a single grid step, split into two so
    # both TensorCores get work (no-op on v5e/v6e beyond one extra cheap step).
    if tm == b128 and b128 >= 256:
        tm = _round_up(b128 // 2, 128)
    b_pad = _round_up(B, tm)
    n_steps = b_pad // tm

    # Single streamed operand: [state | action] with batch transposed into lanes.
    # (Wrapper-side transpose is layout plumbing; padded rows are sliced off.)
    sa = jnp.concatenate([state, action], axis=1)
    if b_pad != B:
        sa = jnp.pad(sa, ((0, b_pad - B), (0, 0)))
    sa_t = sa.astype(jnp.bfloat16).T                       # (in_dim, b_pad)

    const = lambda i: (0, 0)                               # resident operands
    out = pl.pallas_call(
        critic_kernel,
        out_shape=jax.ShapeDtypeStruct((1, b_pad), jnp.float32),
        grid_spec=pltpu.PrefetchScalarGridSpec(
            num_scalar_prefetch=0,
            grid=(n_steps,),
            in_specs=[
                pl.BlockSpec((in_dim, tm), lambda i: (0, i)),       # activations (streamed)
                pl.BlockSpec(w_in_t.shape, const),                  # fused input weight (bf16)
                pl.BlockSpec(w2h_t.shape, const),                   # W2 h1-part (bf16)
                pl.BlockSpec(aux.shape, const),                     # b1/b2/w3 columns (f32)
                pl.BlockSpec(memory_space=pltpu.MemorySpace.SMEM),  # b3 scalar
            ],
            out_specs=pl.BlockSpec((1, tm), lambda i: (0, i)),      # lane-dense q row
        ),
        compiler_params=pltpu.CompilerParams(
            dimension_semantics=("parallel",)),   # v7x: shard batch tiles across TCs
    )(sa_t, w_in_t, w2h_t, aux, b3)
    return out[0, :B].reshape(B, 1)


def init_params(key, state_size, action_size, fc1_units=256, fc2_units=150):
    """Uniform init mirroring the PyTorch module's reset_parameters(); PyTorch layout."""
    in_s = state_size * 2
    in_a = action_size * 2
    in2 = fc1_units + in_a
    ks = jax.random.split(key, 6)

    lim1 = 1.0 / np.sqrt(fc1_units)      # hidden_init uses weight.size()[0]
    lim2 = 1.0 / np.sqrt(fc2_units)

    w1 = jax.random.uniform(ks[0], (fc1_units, in_s), jnp.float32, -lim1, lim1)
    w2 = jax.random.uniform(ks[1], (fc2_units, in2), jnp.float32, -lim2, lim2)
    w3 = jax.random.uniform(ks[2], (1, fc2_units), jnp.float32, -0.003, 0.003)
    # Biases: PyTorch default Linear bias init U(+/- 1/sqrt(fan_in)).
    b1 = jax.random.uniform(ks[3], (fc1_units,), jnp.float32,
                            -1.0 / np.sqrt(in_s), 1.0 / np.sqrt(in_s))
    b2 = jax.random.uniform(ks[4], (fc2_units,), jnp.float32,
                            -1.0 / np.sqrt(in2), 1.0 / np.sqrt(in2))
    b3 = jax.random.uniform(ks[5], (1,), jnp.float32,
                            -1.0 / np.sqrt(fc2_units), 1.0 / np.sqrt(fc2_units))
    return dict(w1=w1, b1=b1, w2=w2, b2=b2, w3=w3, b3=b3,
                state_size=state_size, action_size=action_size,
                fc1_units=fc1_units, fc2_units=fc2_units)


def pack_params(p):
    """Build kernel operands: fused / transposed / zero-padded weight layouts."""
    fc1, fc2 = p["fc1_units"], p["fc2_units"]
    in_s = p["state_size"] * 2
    in_a = p["action_size"] * 2
    fc2p = _round_up(fc2, 128)            # 150 -> 256; padded rows are exactly zero
    fcm = max(fc1, fc2p)

    w1 = p["w1"]                          # (fc1, in_s)
    w2h = p["w2"][:, :fc1]                # (fc2, fc1)
    w2a = p["w2"][:, fc1:]                # (fc2, in_a)

    # Block-diagonal fused input weight: one MXU pass gives both the fc1
    # pre-activations and the action contribution to fc2 (== the PyTorch concat).
    w_in = jnp.zeros((fc1 + fc2p, in_s + in_a), jnp.float32)
    w_in = w_in.at[:fc1, :in_s].set(w1)
    w_in = w_in.at[fc1:fc1 + fc2, in_s:].set(w2a)

    w2h_p = jnp.zeros((fc2p, fc1), jnp.float32).at[:fc2, :].set(w2h)

    # Bias / W3 columns stacked along sublanes: [b1 ; b2 ; w3], aligned slices.
    aux = jnp.zeros((3 * fcm, 1), jnp.float32)
    aux = aux.at[0:fc1, 0].set(p["b1"])
    aux = aux.at[fcm:fcm + fc2, 0].set(p["b2"])
    aux = aux.at[2 * fcm:2 * fcm + fc2, 0].set(p["w3"][0])

    b3 = p["b3"].reshape(1, 1).astype(jnp.float32)
    return (w_in.astype(jnp.bfloat16), w2h_p.astype(jnp.bfloat16), aux, b3)


def reference_forward(state, action, p):
    """Pure-JAX reference with the same bf16-operand / f32-accumulate numerics."""
    s = state.astype(jnp.bfloat16)
    a = action.astype(jnp.bfloat16)
    w1 = p["w1"].astype(jnp.bfloat16)
    w2 = p["w2"].astype(jnp.bfloat16)
    h1 = jnp.maximum(jnp.dot(s, w1.T, preferred_element_type=jnp.float32) + p["b1"], 0.0)
    x = jnp.concatenate([h1.astype(jnp.bfloat16), a], axis=1)
    h2 = jnp.maximum(jnp.dot(x, w2.T, preferred_element_type=jnp.float32) + p["b2"], 0.0)
    return jnp.dot(h2, p["w3"].T) + p["b3"]


if __name__ == "__main__":
    state_size = 8     # state input dim  = state_size * 2 = 16
    action_size = 4    # action input dim = action_size * 2 = 8
    batch = 8

    key = jax.random.PRNGKey(0)
    k_s, k_a, k_p = jax.random.split(key, 3)

    state = jax.random.normal(k_s, (batch, state_size * 2), jnp.float32)
    action = jax.random.normal(k_a, (batch, action_size * 2), jnp.float32)

    params = init_params(k_p, state_size, action_size)
    kernel_params = pack_params(params)

    q = critic_forward(state, action, kernel_params)
    jax.block_until_ready(q)

    q_ref = reference_forward(state, action, params)
    assert q.shape == (batch, 1), q.shape
    assert jnp.allclose(q, q_ref, atol=1e-2, rtol=1e-2), (q, q_ref)

    print("KERNEL_OK")
</pallas_src>

<mosaic_0001>
module attributes {stable_mosaic.version = 11 : i64} {
  func.func @critic_kernel(%arg0: i32, %arg1: memref<24x128xbf16, #tpu.memory_space<vmem>>, %arg2: memref<512x24xbf16, #tpu.memory_space<vmem>>, %arg3: memref<256x256xbf16, #tpu.memory_space<vmem>>, %arg4: memref<768x1xf32, #tpu.memory_space<vmem>>, %arg5: memref<1x1xf32, #tpu.memory_space<smem>>, %arg6: memref<1x128xf32, #tpu.memory_space<vmem>>) attributes {dimension_semantics = [#tpu.dimension_semantics<parallel>], iteration_bounds = array<i64: 1>, scalar_prefetch = 0 : i64, scratch_operands = 0 : i64, tpu.core_type = #tpu.core_type<tc>, window_params = [{transform_indices = @transform_0, window_bounds = array<i64: 24, 128>}, {pipeline_mode = #tpu.pipeline_mode<synchronous>, transform_indices = @transform_1, window_bounds = array<i64: 512, 24>}, {pipeline_mode = #tpu.pipeline_mode<synchronous>, transform_indices = @transform_2, window_bounds = array<i64: 256, 256>}, {pipeline_mode = #tpu.pipeline_mode<synchronous>, transform_indices = @transform_3, window_bounds = array<i64: 768, 1>}, {transform_indices = @transform_4, window_bounds = array<i64: 1, 1>}, {transform_indices = @transform_5, window_bounds = array<i64: 1, 128>}]} {
    %c0 = arith.constant 0 : index
    %c0_0 = arith.constant 0 : index
    %0 = vector.load %arg2[%c0, %c0_0] : memref<512x24xbf16, #tpu.memory_space<vmem>>, vector<512x24xbf16>
    %c0_1 = arith.constant 0 : index
    %c0_2 = arith.constant 0 : index
    %1 = vector.load %arg1[%c0_1, %c0_2] : memref<24x128xbf16, #tpu.memory_space<vmem>>, vector<24x128xbf16>
    %cst = arith.constant dense<0.000000e+00> : vector<512x128xf32>
    %2 = tpu.matmul %0, %1, %cst {dimension_numbers = #tpu.dot_dimension_numbers<[1], [0], [0], [1], [0, 0, 1, 1], [], []>} : vector<512x24xbf16>, vector<24x128xbf16>, vector<512x128xf32> -> vector<512x128xf32>
    %c0_3 = arith.constant 0 : index
    %c0_4 = arith.constant 0 : index
    %3 = vector.load %arg4[%c0_3, %c0_4] : memref<768x1xf32, #tpu.memory_space<vmem>>, vector<256x1xf32>
    %c256 = arith.constant 256 : index
    %c0_5 = arith.constant 0 : index
    %4 = vector.load %arg4[%c256, %c0_5] : memref<768x1xf32, #tpu.memory_space<vmem>>, vector<256x1xf32>
    %c512 = arith.constant 512 : index
    %c0_6 = arith.constant 0 : index
    %5 = vector.load %arg4[%c512, %c0_6] : memref<768x1xf32, #tpu.memory_space<vmem>>, vector<256x1xf32>
    %6 = vector.extract_strided_slice %2 {offsets = [0, 0], sizes = [256, 128], strides = [1, 1]} : vector<512x128xf32> to vector<256x128xf32>
    %7 = vector.broadcast %3 : vector<256x1xf32> to vector<256x128xf32>
    %8 = arith.addf %6, %7 : vector<256x128xf32>
    %cst_7 = arith.constant 0.000000e+00 : f32
    %9 = vector.broadcast %cst_7 : f32 to vector<256x128xf32>
    %10 = arith.maximumf %8, %9 : vector<256x128xf32>
    %11 = arith.truncf %10 : vector<256x128xf32> to vector<256x128xbf16>
    %c0_8 = arith.constant 0 : index
    %c0_9 = arith.constant 0 : index
    %12 = vector.load %arg3[%c0_8, %c0_9] : memref<256x256xbf16, #tpu.memory_space<vmem>>, vector<256x256xbf16>
    %cst_10 = arith.constant dense<0.000000e+00> : vector<256x128xf32>
    %13 = tpu.matmul %12, %11, %cst_10 {dimension_numbers = #tpu.dot_dimension_numbers<[1], [0], [0], [1], [0, 0, 1, 1], [], []>} : vector<256x256xbf16>, vector<256x128xbf16>, vector<256x128xf32> -> vector<256x128xf32>
    %14 = vector.extract_strided_slice %2 {offsets = [256, 0], sizes = [256, 128], strides = [1, 1]} : vector<512x128xf32> to vector<256x128xf32>
    %15 = arith.addf %13, %14 : vector<256x128xf32>
    %16 = vector.broadcast %4 : vector<256x1xf32> to vector<256x128xf32>
    %17 = arith.addf %15, %16 : vector<256x128xf32>
    %cst_11 = arith.constant 0.000000e+00 : f32
    %18 = vector.broadcast %cst_11 : f32 to vector<256x128xf32>
    %19 = arith.maximumf %17, %18 : vector<256x128xf32>
    %20 = vector.broadcast %5 : vector<256x1xf32> to vector<256x128xf32>
    %21 = arith.mulf %19, %20 : vector<256x128xf32>
    %cst_12 = arith.constant dense<0.000000e+00> : vector<128xf32>
    %22 = vector.multi_reduction <add>, %21, %cst_12 [0] : vector<256x128xf32> to vector<128xf32>
    %23 = vector.shape_cast %22 : vector<128xf32> to vector<1x128xf32>
    %c0_13 = arith.constant 0 : index
    %c0_14 = arith.constant 0 : index
    %24 = memref.load %arg5[%c0_13, %c0_14] : memref<1x1xf32, #tpu.memory_space<smem>>
    %25 = vector.broadcast %24 : f32 to vector<1x128xf32>
    %26 = arith.addf %23, %25 : vector<1x128xf32>
    %c0_15 = arith.constant 0 : index
    %c0_16 = arith.constant 0 : index
    %27 = vector.load %arg6[%c0_15, %c0_16] : memref<1x128xf32, #tpu.memory_space<vmem>>, vector<1x128xf32>
    tpu.vector_store %arg6[%c0_15, %c0_16], %26 {strides = array<i32>} : memref<1x128xf32, #tpu.memory_space<vmem>>, vector<1x128xf32>,
    return
  }
  func.func @transform_0(%arg0: i32) -> (i32, i32) {
    %c0_i32 = arith.constant 0 : i32
    %c0_i32_0 = arith.constant 0 : i32
    return %c0_i32, %arg0 : i32, i32
  }
  func.func @transform_1(%arg0: i32) -> (i32, i32) {
    %c0_i32 = arith.constant 0 : i32
    %c0_i32_0 = arith.constant 0 : i32
    %c0_i32_1 = arith.constant 0 : i32
    return %c0_i32, %c0_i32_0 : i32, i32
  }
  func.func @transform_2(%arg0: i32) -> (i32, i32) {
    %c0_i32 = arith.constant 0 : i32
    %c0_i32_0 = arith.constant 0 : i32
    %c0_i32_1 = arith.constant 0 : i32
    return %c0_i32, %c0_i32_0 : i32, i32
  }
  func.func @transform_3(%arg0: i32) -> (i32, i32) {
    %c0_i32 = arith.constant 0 : i32
    %c0_i32_0 = arith.constant 0 : i32
    %c0_i32_1 = arith.constant 0 : i32
    return %c0_i32, %c0_i32_0 : i32, i32
  }
  func.func @transform_4(%arg0: i32) -> (i32, i32) {
    %c0_i32 = arith.constant 0 : i32
    %c0_i32_0 = arith.constant 0 : i32
    %c0_i32_1 = arith.constant 0 : i32
    return %c0_i32, %c0_i32_0 : i32, i32
  }
  func.func @transform_5(%arg0: i32) -> (i32, i32) {
    %c0_i32 = arith.constant 0 : i32
    %c0_i32_0 = arith.constant 0 : i32
    return %c0_i32, %arg0 : i32, i32
  }
}

</mosaic_0001>

<bundles_post_ra>
// kernel: tpu_custom_call.1
= control target key start
LH: loop header
LB: loop body
LE: loop exit
PB: predicated region body
PF: predicated region fallthrough
CT: control target
= control target key end

     0   :  { %vm356_vm0 = vcmask 1043456   ;;  %v2246_v2 = vmov 0   ;;  %vm259_vm1 = vcmask 195584   ;;  %s3190_s0 = inlined_call_operand.vmem [shape: bf16[24,128], index: 0, kind: input, shape index: {}]   ;;  %s3191_s1 = inlined_call_operand.vmem [shape: bf16[512,24], index: 1, kind: input, shape index: {}]   ;;  %s3192_s2 = inlined_call_operand.vmem [shape: bf16[256,256], index: 2, kind: input, shape index: {}]   ;;  %s3193_s3 = inlined_call_operand.vmem [shape: f32[768,1], index: 3, kind: input, shape index: {}]   ;;  %s3194_s4 = inlined_call_operand.<no memory space> [shape: f32[1,1], index: 4, kind: input, shape index: {}]   ;;  %s3195_s5 = inlined_call_operand.hbm [shape: f32[1,128], index: 5, kind: output, shape index: {}]  }
   0x1   :  { %v679_v0 = vld [vmem:[%s3193_s3 + $0xf0] sm:$0xff]  ;;  %2141 = vset.pattern.permute.xlu1 %v2246_v2  ;;  %2140 = vset.pattern.permute.xlu0 %v2246_v2  ;;  %v2142_v3 = vld [vmem:[%s3190_s0 + $0x8] ss:$0 sps:$4 sm:$0xff]   ;;  %v2143_v4 = vld [vmem:[%s3190_s0] sm:$0xff]  }
   0x2   :  { %v663_v1 = vld [vmem:[%s3193_s3 + $0x70] sm:$0xff]  ;;  %897 = vperm.xlu0 %2140, %v679_v0   ;;  %2137 = vmatprep.subr.msk.bf16.mxu0 %vm356_vm0, %v2142_v3  ;;  %v358_v5 = vsel %vm356_vm0, %v2142_v3, 0  ;;  %v680_v6 = vld [vmem:[%s3193_s3 + $0xf8] sm:$0xff]  ;;  %v2144_v8 = vld [vmem:[%s3191_s1] sm:$0xff]  }
   0x3   :  { %817 = vperm.xlu1 %2141, %v663_v1   ;;  %v664_v7 = vld [vmem:[%s3193_s3 + $0x78] sm:$0xff]  ;;  %2054 = vmatpush3.bf16.msra.mxu0 %v358_v5  ;;  %v677_v9 = vld [vmem:[%s3193_s3 + $0xe0] sm:$0xff]  ;;  %v678_v10 = vld [vmem:[%s3193_s3 + $0xe8] sm:$0xff] }
   0x4   :  { %2055 = vmatprep.subr.bf16.mxu0 %v2143_v4  ;;  %2057 = vmatprep.mubr.msk.bf16.mxu0 %vm259_vm1, %v2144_v8  ;;  %v2145_v11 = vld [vmem:[%s3191_s1 + $0x8] sm:$0xff]   ;;  %v2146_v12 = vld [vmem:[%s3191_s1 + $0x10] sm:$0xff]   ;;  %v661_v14 = vld [vmem:[%s3193_s3 + $0x60] sm:$0xff] }
   0x5   :  { %v662_v13 = vld [vmem:[%s3193_s3 + $0x68] sm:$0xff]  ;;  %v676_v15 = vld [vmem:[%s3193_s3 + $0xd8] sm:$0xff]  ;;  %v675_v16 = vld [vmem:[%s3193_s3 + $0xd0] sm:$0xff] }
   0x6   :  { %902 = vperm.xlu0 %2140, %v680_v6   ;;  %v2147_v17 = vld [vmem:[%s3191_s1 + $0x18] sm:$0xff]   ;;  %v2148_v18 = vld [vmem:[%s3191_s1 + $0x20] sm:$0xff]   ;;  %v659_v20 = vld [vmem:[%s3193_s3 + $0x50] sm:$0xff] }
   0x7   :  { %822 = vperm.xlu1 %2141, %v664_v7   ;;  %2056 = vmatpush3.bf16.msra.mxu0 %v2143_v4  ;;  %v660_v19 = vld [vmem:[%s3193_s3 + $0x58] sm:$0xff]  ;;  %v674_v21 = vld [vmem:[%s3193_s3 + $0xc8] sm:$0xff]  ;;  %v673_v22 = vld [vmem:[%s3193_s3 + $0xc0] sm:$0xff] }
   0x8   :  { %v2149_v23 = vld [vmem:[%s3191_s1 + $0x28] sm:$0xff]   ;;  %v2150_v24 = vld [vmem:[%s3191_s1 + $0x30] sm:$0xff]   ;;  %v657_v26 = vld [vmem:[%s3193_s3 + $0x40] sm:$0xff] }
   0x9   :  { %v658_v25 = vld [vmem:[%s3193_s3 + $0x48] sm:$0xff]  ;;  %v672_v27 = vld [vmem:[%s3193_s3 + $0xb8] sm:$0xff]  ;;  %v671_v28 = vld [vmem:[%s3193_s3 + $0xb0] sm:$0xff] }
   0xa   :  { %887 = vperm.xlu0 %2140, %v677_v9   ;;  %2058 = vmatmul.mubr.msk.bf16.vlgmr.msra.gmra.mxu0 %vm259_vm1, %v2145_v11  ;;  %v2151_v29 = vld [vmem:[%s3191_s1 + $0x38] sm:$0xff]   ;;  %v2152_v30 = vld [vmem:[%s3191_s1 + $0x40] sm:$0xff]   ;;  %v655_v32 = vld [vmem:[%s3193_s3 + $0x30] sm:$0xff] }
   0xb   :  { %892 = vperm.xlu1 %2141, %v678_v10   ;;  %2061 = vmatprep.mubr.msk.bf16.mxu0 %vm259_vm1, %v2146_v12  ;;  %v656_v31 = vld [vmem:[%s3193_s3 + $0x38] sm:$0xff]  ;;  %v670_v33 = vld [vmem:[%s3193_s3 + $0xa8] sm:$0xff]  ;;  %v669_v34 = vld [vmem:[%s3193_s3 + $0xa0] sm:$0xff] }
   0xc   :  { %v2153_v35 = vld [vmem:[%s3191_s1 + $0x48] sm:$0xff]   ;;  %v2154_v36 = vld [vmem:[%s3191_s1 + $0x50] sm:$0xff]   ;;  %v653_v38 = vld [vmem:[%s3193_s3 + $0x20] sm:$0xff] }
   0xd   :  { %v654_v37 = vld [vmem:[%s3193_s3 + $0x28] sm:$0xff]  ;;  %v668_v39 = vld [vmem:[%s3193_s3 + $0x98] sm:$0xff]  ;;  %v667_v40 = vld [vmem:[%s3193_s3 + $0x90] sm:$0xff] }
   0xe   :  { %807 = vperm.xlu0 %2140, %v661_v14   ;;  %v2155_v41 = vld [vmem:[%s3191_s1 + $0x58] sm:$0xff]   ;;  %v2156_v42 = vld [vmem:[%s3191_s1 + $0x60] sm:$0xff]   ;;  %v651_v44 = vld [vmem:[%s3193_s3 + $0x10] sm:$0xff] }
   0xf   :  { %812 = vperm.xlu1 %2141, %v662_v13   ;;  %v652_v43 = vld [vmem:[%s3193_s3 + $0x18] sm:$0xff]  ;;  %v666_v45 = vld [vmem:[%s3193_s3 + $0x88] sm:$0xff]  ;;  %v665_v46 = vld [vmem:[%s3193_s3 + $0x80] sm:$0xff] }
  0x10   :  { %v2157_v47 = vld [vmem:[%s3191_s1 + $0x68] sm:$0xff]   ;;  %v2158_v48 = vld [vmem:[%s3191_s1 + $0x70] sm:$0xff]   ;;  %v649_v50 = vld [vmem:[%s3193_s3] sm:$0xff] }
  0x11   :  { %v650_v49 = vld [vmem:[%s3193_s3 + $0x8] sm:$0xff]  ;;  %v681_v52 = vld [vmem:[%s3193_s3 + $0x100] sm:$0xff]  ;;  %v2159_v53 = vld [vmem:[%s3191_s1 + $0x78] sm:$0xff]  }
  0x12   :  { %877 = vperm.xlu0 %2140, %v675_v16   ;;  %2062 = vmatmul.mubr.msk.bf16.gmra.mxu0 %vm259_vm1, %v2147_v17  ;;  %v682_v51 = vld [vmem:[%s3193_s3 + $0x108] sm:$0xff]  ;;  %v684_v54 = vld [vmem:[%s3193_s3 + $0x118] sm:$0xff]  ;;  %v683_v55 = vld [vmem:[%s3193_s3 + $0x110] sm:$0xff] }
  0x13   :  { %882 = vperm.xlu1 %2141, %v676_v15   ;;  %2065 = vmatprep.mubr.msk.bf16.mxu0 %vm259_vm1, %v2148_v18  ;;  %v686_v56 = vld [vmem:[%s3193_s3 + $0x128] sm:$0xff]  ;;  %v685_v57 = vld [vmem:[%s3193_s3 + $0x120] sm:$0xff] }
  0x16   :  { %797 = vperm.xlu0 %2140, %v659_v20  }
  0x17   :  { %802 = vperm.xlu1 %2141, %v660_v19  }
  0x1a   :  { %867 = vperm.xlu0 %2140, %v673_v22   ;;  %2066 = vmatmul.mubr.msk.bf16.gmra.mxu0 %vm259_vm1, %v2149_v23 }
  0x1b   :  { %872 = vperm.xlu1 %2141, %v674_v21   ;;  %2069 = vmatprep.mubr.msk.bf16.mxu0 %vm259_vm1, %v2150_v24 }
  0x1e   :  { %787 = vperm.xlu0 %2140, %v657_v26  }
  0x1f   :  { %792 = vperm.xlu1 %2141, %v658_v25  }
  0x22   :  { %857 = vperm.xlu0 %2140, %v671_v28   ;;  %2070 = vmatmul.mubr.msk.bf16.gmra.mxu0 %vm259_vm1, %v2151_v29 }
  0x23   :  { %862 = vperm.xlu1 %2141, %v672_v27   ;;  %2073 = vmatprep.mubr.msk.bf16.mxu0 %vm259_vm1, %v2152_v30 }
  0x26   :  { %777 = vperm.xlu0 %2140, %v655_v32  }
  0x27   :  { %782 = vperm.xlu1 %2141, %v656_v31  }
  0x2a   :  { %847 = vperm.xlu0 %2140, %v669_v34   ;;  %2074 = vmatmul.mubr.msk.bf16.gmra.mxu0 %vm259_vm1, %v2153_v35 }
  0x2b   :  { %852 = vperm.xlu1 %2141, %v670_v33   ;;  %2077 = vmatprep.mubr.msk.bf16.mxu0 %vm259_vm1, %v2154_v36 }
  0x2e   :  { %767 = vperm.xlu0 %2140, %v653_v38  }
  0x2f   :  { %772 = vperm.xlu1 %2141, %v654_v37  }
  0x32   :  { %837 = vperm.xlu0 %2140, %v667_v40   ;;  %2078 = vmatmul.mubr.msk.bf16.gmra.mxu0 %vm259_vm1, %v2155_v41 }
  0x33   :  { %842 = vperm.xlu1 %2141, %v668_v39   ;;  %2081 = vmatprep.mubr.msk.bf16.mxu0 %vm259_vm1, %v2156_v42 }
  0x36   :  { %757 = vperm.xlu0 %2140, %v651_v44  }
  0x37   :  { %762 = vperm.xlu1 %2141, %v652_v43  }
  0x3a   :  { %827 = vperm.xlu0 %2140, %v665_v46   ;;  %2082 = vmatmul.mubr.msk.bf16.gmra.mxu0 %vm259_vm1, %v2157_v47 }
  0x3b   :  { %832 = vperm.xlu1 %2141, %v666_v45   ;;  %2085 = vmatprep.mubr.msk.bf16.mxu0 %vm259_vm1, %v2158_v48 }
  0x3e   :  { %747 = vperm.xlu0 %2140, %v649_v50  }
  0x3f   :  { %752 = vperm.xlu1 %2141, %v650_v49  }
  0x42   :  { %1340 = vperm.xlu0 %2140, %v681_v52   ;;  %2086 = vmatmul.mubr.msk.bf16.gmra.mxu0 %vm259_vm1, %v2159_v53 }
  0x43   :  { %1345 = vperm.xlu1 %2141, %v682_v51  }
  0x46   :  { %1350 = vperm.xlu0 %2140, %v683_v55  }
  0x47   :  { %1355 = vperm.xlu1 %2141, %v684_v54  }
  0x48   :  { %11 = vsyncpa [#allocation4], 0  ;;  %v688_v58 = vld [vmem:[%s3193_s3 + $0x138] sm:$0xff]  ;;  %v687_v59 = vld [vmem:[%s3193_s3 + $0x130] sm:$0xff]  ;;  %s2247_s24 = smov [#allocation3]  }
  0x49   :  { %v690_v60 = vld [vmem:[%s3193_s3 + $0x148] sm:$0xff]  ;;  %v689_v61 = vld [vmem:[%s3193_s3 + $0x140] sm:$0xff]  ;;  %v692_v62 = vld [vmem:[%s3193_s3 + $0x158] sm:$0xff]  ;;  %s1801_s25 = sshll.u32 %s2247_s24, 4  ;;  %s1802_s25 = int_to_ptr.vmem [resolvable:$true] %s1801_s25 }
  0x4a   :  { %1360 = vperm.xlu0 %2140, %v685_v57   ;;  %v691_v63 = vld [vmem:[%s3193_s3 + $0x150] sm:$0xff]  ;;  %v694_v0 = vld [vmem:[%s3193_s3 + $0x168] sm:$0xff]  ;;  %v693_v1 = vld [vmem:[%s3193_s3 + $0x160] sm:$0xff]  ;;  %s2224_s26 = scalar_lea.vmem %s1802_s25, 16  ;;  %s2228_s27 = scalar_lea.vmem %s1802_s25, 32 }
  0x4b   :  { %1365 = vperm.xlu1 %2141, %v686_v56   ;;  %v696_v2 = vld [vmem:[%s3193_s3 + $0x178] sm:$0xff]  ;;  %v695_v3 = vld [vmem:[%s3193_s3 + $0x170] sm:$0xff]  ;;  %v698_v4 = vld [vmem:[%s3193_s3 + $0x188] sm:$0xff]  ;;  %p2225_p0 = scmp.ne.s32.totalorder %s1802_s25, %s2224_s26  ;;  %p2229_p1 = scmp.lt.s32.totalorder %s1802_s25, %s1802_s25 }
  0x4c   :  { %v697_v5 = vld [vmem:[%s3193_s3 + $0x180] sm:$0xff]  ;;  %v700_v6 = vld [vmem:[%s3193_s3 + $0x198] sm:$0xff]  ;;  %v699_v7 = vld [vmem:[%s3193_s3 + $0x190] sm:$0xff]  ;;  %p2230_p2 = scmp.lt.s32.totalorder %s2228_s27, %s2224_s26 }
  0x4d   :  { %v702_v8 = vld [vmem:[%s3193_s3 + $0x1a8] sm:$0xff]  ;;  %v701_v9 = vld [vmem:[%s3193_s3 + $0x1a0] sm:$0xff]  ;;  %v704_v10 = vld [vmem:[%s3193_s3 + $0x1b8] sm:$0xff] }
  0x4e   :  { %1370 = vperm.xlu0 %2140, %v687_v59   ;;  %v703_v11 = vld [vmem:[%s3193_s3 + $0x1b0] sm:$0xff]  ;;  %v2160_v12 = vld [vmem:[%s3191_s1 + $0x80] sm:$0xff]   ;;  %v2161_v13 = vld [vmem:[%s3191_s1 + $0x88] sm:$0xff]   ;;  %p2231_p3 = por %p2230_p2, %p2229_p1 }
  0x4f   :  { %1375 = vperm.xlu1 %2141, %v688_v58   ;;  %v706_v14 = vld [vmem:[%s3193_s3 + $0x1c8] sm:$0xff]  ;;  %v705_v15 = vld [vmem:[%s3193_s3 + $0x1c0] sm:$0xff]  ;;  %2089 = vmatprep.mubr.msk.bf16.mxu0 %vm259_vm1, %v2160_v12  ;;  %v708_v16 = vld [vmem:[%s3193_s3 + $0x1d8] sm:$0xff] }
  0x50   :  { %2090 = vmatmul.mubr.msk.bf16.gmra.mxu0 %vm259_vm1, %v2161_v13  ;;  %v707_v17 = vld [vmem:[%s3193_s3 + $0x1d0] sm:$0xff]  ;;  %v2163_v19 = vld [vmem:[%s3191_s1 + $0x98] sm:$0xff]   ;;  %v713_v20 = vld [vmem:[%s3193_s3 + $0x200] sm:$0xff]  ;;  %p2232_p4 = pnand %p2231_p3, %p2225_p0 }
  0x51   :  { %v2162_v18 = vld [vmem:[%s3191_s1 + $0x90] sm:$0xff]   ;;  %v709_v21 = vld [vmem:[%s3193_s3 + $0x1e0] sm:$0xff]  ;;  %v714_v23 = vld [vmem:[%s3193_s3 + $0x208] sm:$0xff] }
  0x52   :  { %1380 = vperm.xlu0 %2140, %v689_v61   ;;  %2093 = vmatprep.mubr.msk.bf16.mxu0 %vm259_vm1, %v2162_v18  ;;  %v715_v22 = vld [vmem:[%s3193_s3 + $0x210] sm:$0xff]  ;;  %v2164_v24 = vld [vmem:[%s3191_s1 + $0xa0] sm:$0xff]   ;;  %v2165_v27 = vld [vmem:[%s3191_s1 + $0xa8] sm:$0xff]  }
  0x53   :  { %1385 = vperm.xlu1 %2141, %v690_v60   ;;  %v717_v28 = vld [vmem:[%s3193_s3 + $0x220] sm:$0xff]  ;;  %v716_v29 = vld [vmem:[%s3193_s3 + $0x218] sm:$0xff]  ;;  %v719_v32 = vld [vmem:[%s3193_s3 + $0x230] sm:$0xff] }
  0x54   :  { %v718_v33 = vld [vmem:[%s3193_s3 + $0x228] sm:$0xff]  ;;  %v2166_v34 = vld [vmem:[%s3191_s1 + $0xb0] sm:$0xff]   ;;  %v2167_v37 = vld [vmem:[%s3191_s1 + $0xb8] sm:$0xff]  }
  0x55   :  { %v721_v38 = vld [vmem:[%s3193_s3 + $0x240] sm:$0xff]  ;;  %v720_v39 = vld [vmem:[%s3193_s3 + $0x238] sm:$0xff]  ;;  %v723_v42 = vld [vmem:[%s3193_s3 + $0x250] sm:$0xff] }
  0x56   :  { %1390 = vperm.xlu0 %2140, %v691_v63   ;;  %v722_v43 = vld [vmem:[%s3193_s3 + $0x248] sm:$0xff]  ;;  %v2168_v44 = vld [vmem:[%s3191_s1 + $0xc0] sm:$0xff]   ;;  %v724_v48 = vld [vmem:[%s3193_s3 + $0x258] sm:$0xff] }
  0x57   :  { %1395 = vperm.xlu1 %2141, %v692_v62   ;;  %v2169_v45 = vld [vmem:[%s3191_s1 + $0xc8] sm:$0xff]   ;;  %v725_v47 = vld [vmem:[%s3193_s3 + $0x260] sm:$0xff]  ;;  %v727_v50 = vld [vmem:[%s3193_s3 + $0x270] sm:$0xff] }
  0x58   :  { %2094 = vmatmul.mubr.msk.bf16.gmra.mxu0 %vm259_vm1, %v2163_v19  ;;  %v726_v51 = vld [vmem:[%s3193_s3 + $0x268] sm:$0xff]  ;;  %v2170_v53 = vld [vmem:[%s3191_s1 + $0xd0] sm:$0xff]   ;;  %v2171_v54 = vld [vmem:[%s3191_s1 + $0xd8] sm:$0xff]  }
  0x59   :  { %2097 = vmatprep.mubr.msk.bf16.mxu0 %vm259_vm1, %v2164_v24  ;;  %v729_v56 = vld [vmem:[%s3193_s3 + $0x280] sm:$0xff]  ;;  %v728_v57 = vld [vmem:[%s3193_s3 + $0x278] sm:$0xff]  ;;  %v731_v59 = vld [vmem:[%s3193_s3 + $0x290] sm:$0xff] }
  0x5a   :  { %1400 = vperm.xlu0 %2140, %v693_v1   ;;  %v730_v60 = vld [vmem:[%s3193_s3 + $0x288] sm:$0xff]  ;;  %v2172_v62 = vld [vmem:[%s3191_s1 + $0xe0] sm:$0xff]   ;;  %v732_v1 = vld [vmem:[%s3193_s3 + $0x298] sm:$0xff] }
  0x5b   :  { %1405 = vperm.xlu1 %2141, %v694_v0   ;;  %v2173_v63 = vld [vmem:[%s3191_s1 + $0xe8] sm:$0xff]   ;;  %v733_v0 = vld [vmem:[%s3193_s3 + $0x2a0] sm:$0xff]  ;;  %v739_v12 = vld [vmem:[%s3193_s3 + $0x2d0] sm:$0xff] }
  0x5c   :  { %v738_v13 = vld [vmem:[%s3193_s3 + $0x2c8] sm:$0xff]  ;;  %v740_v18 = vld [vmem:[%s3193_s3 + $0x2d8] sm:$0xff] }
  0x5d   :  { %v710_v19 = vld [vmem:[%s3193_s3 + $0x1e8] sm:$0xff] }
  0x5e   :  { %1410 = vperm.xlu0 %2140, %v695_v3   ;;  %v742_v24 = vld [vmem:[%s3193_s3 + $0x2e8] sm:$0xff] }
  0x5f   :  { %1415 = vperm.xlu1 %2141, %v696_v2  }
  0x60   :  { %2098 = vmatmul.mubr.msk.bf16.gmra.mxu0 %vm259_vm1, %v2165_v27  ;;  %v712_v27 = vld [vmem:[%s3193_s3 + $0x1f8] sm:$0xff] }
  0x61   :  { %2101 = vmatprep.mubr.msk.bf16.mxu0 %vm259_vm1, %v2166_v34 }
  0x62   :  { %1420 = vperm.xlu0 %2140, %v697_v5   ;;  %v734_v5 = vld [vmem:[%s3193_s3 + $0x2a8] sm:$0xff] }
  0x63   :  { %1425 = vperm.xlu1 %2141, %v698_v4   ;;  %v735_v4 = vld [vmem:[%s3193_s3 + $0x2b0] sm:$0xff] }
  0x66   :  { %1430 = vperm.xlu0 %2140, %v699_v7   ;;  %v2175_v7 = vld [vmem:[%s3191_s1 + $0xf8] sm:$0xff]  }
  0x67   :  { %1435 = vperm.xlu1 %2141, %v700_v6   ;;  %v2174_v6 = vld [vmem:[%s3191_s1 + $0xf0] sm:$0xff]  }
  0x68   :  { %2102 = vmatmul.mubr.msk.bf16.gmra.mxu0 %vm259_vm1, %v2167_v37 }
  0x69   :  { %2105 = vmatprep.mubr.msk.bf16.mxu0 %vm259_vm1, %v2168_v44 }
  0x6a   :  { %1440 = vperm.xlu0 %2140, %v701_v9   ;;  %v737_v9 = vld [vmem:[%s3193_s3 + $0x2c0] sm:$0xff] }
  0x6b   :  { %1445 = vperm.xlu1 %2141, %v702_v8  }
  0x6e   :  { %1450 = vperm.xlu0 %2140, %v703_v11  }
  0x6f   :  { %1455 = vperm.xlu1 %2141, %v704_v10   ;;  %v736_v10 = vld [vmem:[%s3193_s3 + $0x2b8] sm:$0xff] }
  0x70   :  { %2106 = vmatmul.mubr.msk.bf16.gmra.mxu0 %vm259_vm1, %v2169_v45 }
  0x71   :  { %2109 = vmatprep.mubr.msk.bf16.mxu0 %vm259_vm1, %v2170_v53 }
  0x72   :  { %1460 = vperm.xlu0 %2140, %v705_v15   ;;  %v2178_v15 = vld [vmem:[%s3192_s2 + $0x14] ss:$8 sps:$4 sm:$0xff]  }
  0x73   :  { %1465 = vperm.xlu1 %2141, %v706_v14   ;;  %1217 = vmatprep.mubr.bf16.mxu1 %v2178_v15 }
  0x76   :  { %1470 = vperm.xlu0 %2140, %v707_v17  }
  0x77   :  { %1475 = vperm.xlu1 %2141, %v708_v16   ;;  %v2181_v16 = vld [vmem:[%s3192_s2 + $0x4] ss:$8 sps:$4 sm:$0xff]  }
  0x78   :  { %2110 = vmatmul.mubr.msk.bf16.gmra.mxu0 %vm259_vm1, %v2171_v54 }
  0x79   :  { %2113 = vmatprep.mubr.msk.bf16.mxu0 %vm259_vm1, %v2172_v62 }
  0x7a   :  { %1480 = vperm.xlu0 %2140, %v709_v21   ;;  %v741_v21 = vld [vmem:[%s3193_s3 + $0x2e0] sm:$0xff] }
  0x7b   :  { %1564 = vperm.xlu1 %2141, %v713_v20  }
  0x7d   :  { %v2559_v25 = vpop.permute.xlu0 %897 }
  0x7e   :  { %v2561_v26 = vpop.permute.xlu1 %817  ;;  %1569 = vperm.xlu0 %2140, %v714_v23  }
  0x7f   :  { %1574 = vperm.xlu1 %2141, %v715_v22   ;;  %v711_v22 = vld [vmem:[%s3193_s3 + $0x1f0] sm:$0xff] }
  0x80   :  { %2114 = vmatmul.mubr.msk.bf16.gmra.mxu0 %vm259_vm1, %v2173_v63 }
  0x81   :  { %v2574_v30 = vpop.permute.xlu0 %902  ;;  %2117 = vmatprep.mubr.msk.bf16.mxu0 %vm259_vm1, %v2174_v6 }
  0x82   :  { %v2576_v31 = vpop.permute.xlu1 %822  ;;  %1579 = vperm.xlu0 %2140, %v716_v29  }
  0x83   :  { %1584 = vperm.xlu1 %2141, %v717_v28  }
  0x85   :  { %v2587_v35 = vpop.permute.xlu0 %887 }
  0x86   :  { %v2589_v36 = vpop.permute.xlu1 %892  ;;  %1589 = vperm.xlu0 %2140, %v718_v33   ;;  %v743_v33 = vld [vmem:[%s3193_s3 + $0x2f0] sm:$0xff] }
  0x87   :  { %1594 = vperm.xlu1 %2141, %v719_v32   ;;  %v744_v32 = vld [vmem:[%s3193_s3 + $0x2f8] sm:$0xff] }
  0x88   :  { %2118 = vmatmul.mubr.msk.bf16.gmra.mxu0 %vm259_vm1, %v2175_v7 }
  0x89   :  { %v2602_v40 = vpop.permute.xlu0 %807  ;;  %1209 = vmatprep.mubr.bf16.mxu0 %v2181_v16 }
  0x8a   :  { %v2604_v41 = vpop.permute.xlu1 %812  ;;  %1599 = vperm.xlu0 %2140, %v720_v39  }
  0x8b   :  { %1604 = vperm.xlu1 %2141, %v721_v38  }
  0x8d   :  { %v2618_v46 = vpop.permute.xlu0 %877 }
  0x8e   :  { %1609 = vperm.xlu0 %2140, %v722_v43   ;;  %v2627_v49 = vpop.permute.xlu1 %882 }
  0x8f   :  { %1614 = vperm.xlu1 %2141, %v723_v42  }
  0x91   :  { %v2636_v52 = vpop.permute.xlu0 %797 }
  0x92   :  { %1619 = vperm.xlu0 %2140, %v724_v48   ;;  %v2644_v55 = vpop.permute.xlu1 %802 }
  0x93   :  { %1624 = vperm.xlu1 %2141, %v725_v47  }
  0x95   :  { %v2654_v58 = vpop.permute.xlu0 %867 }
  0x96   :  { %1629 = vperm.xlu0 %2140, %v726_v51   ;;  %v2662_v61 = vpop.permute.xlu1 %872 }
  0x97   :  { %1634 = vperm.xlu1 %2141, %v727_v50  }
  0x99   :  { %v2677_v2 = vpop.permute.xlu0 %787 }
  0x9a   :  { %1639 = vperm.xlu0 %2140, %v728_v57   ;;  %v2680_v3 = vpop.permute.xlu1 %792 }
  0x9b   :  { %1644 = vperm.xlu1 %2141, %v729_v56  }
  0x9d   :  { %v2694_v8 = vpop.permute.xlu0 %857 }
  0x9e   :  { %1649 = vperm.xlu0 %2140, %v730_v60   ;;  %v2703_v11 = vpop.permute.xlu1 %862 }
  0x9f   :  { %1654 = vperm.xlu1 %2141, %v731_v59  }
  0xa1   :  { %v778_v14 = vpop.permute.xlu0 %777 }
  0xa2   :  { %1659 = vperm.xlu0 %2140, %v732_v1   ;;  %v783_v17 = vpop.permute.xlu1 %782 }
  0xa3   :  { %1664 = vperm.xlu1 %2141, %v733_v0  }
  0xa5   :  { %v2724_v20 = vpop.permute.xlu0 %847 }
  0xa6   :  { %1669 = vperm.xlu0 %2140, %v734_v5   ;;  %v2732_v23 = vpop.permute.xlu1 %852 }
  0xa7   :  { %1674 = vperm.xlu1 %2141, %v735_v4  }
  0xa9   :  { %v768_v28 = vpop.permute.xlu0 %767 }
  0xaa   :  { %1679 = vperm.xlu0 %2140, %v736_v10   ;;  %v773_v29 = vpop.permute.xlu1 %772 }
  0xab   :  { %1684 = vperm.xlu1 %2141, %v737_v9  }
  0xad   :  { %v2746_v34 = vpop.permute.xlu0 %837 }
  0xae   :  { %1689 = vperm.xlu0 %2140, %v738_v13   ;;  %v2748_v37 = vpop.permute.xlu1 %842 }
  0xaf   :  { %1694 = vperm.xlu1 %2141, %v739_v12  }
  0xb1   :  { %v758_v38 = vpop.permute.xlu0 %757 }
  0xb2   :  { %1485 = vperm.xlu0 %2140, %v710_v19   ;;  %v763_v39 = vpop.permute.xlu1 %762 }
  0xb3   :  { %1699 = vperm.xlu1 %2141, %v740_v18  }
  0xb5   :  { %v2750_v42 = vpop.permute.xlu0 %827 }
  0xb6   :  { %1490 = vperm.xlu0 %2140, %v711_v22   ;;  %v2752_v44 = vpop.permute.xlu1 %832 }
  0xb7   :  { %1704 = vperm.xlu1 %2141, %v741_v21  }
  0xb9   :  { %v748_v48 = vpop.permute.xlu0 %747 }
  0xba   :  { %1495 = vperm.xlu0 %2140, %v712_v27   ;;  %v753_v54 = vpop.permute.xlu1 %752 }
  0xbb   :  { %1709 = vperm.xlu1 %2141, %v742_v24  }
  0xbe   :  { %1714 = vperm.xlu0 %2140, %v743_v33  }
  0xbf   :  { %1719 = vperm.xlu1 %2141, %v744_v32  }
  0xca   :  { %v2059_v43 = vpop.f32.mrf.mxu0 }
  0xcb   :  { %v907_v47 = vadd.f32 %v2059_v43, %v758_v38 }
  0xcc   :  { %v394_v45 = vpop.f32.mrf.mxu0 }
  0xcd   :  { %v905_v51 = vadd.f32 %v748_v48, %v394_v45  ;;  %v939_v57 = vmax.f32 %v907_v47, 0.0 }
  0xce   :  { %v2060_v50 = vpop.f32.mrf.mxu0 }
  0xcf   :  { %v908_v53 = vadd.f32 %v2060_v50, %v763_v39  ;;  %v937_v63 = vmax.f32 %v905_v51, 0.0 }
  0xd0   :  { %v397_v56 = vpop.f32.mrf.mxu0 }
  0xd1   :  { %v940_v59 = vmax.f32 %v908_v53, 0.0  ;;  %v906_v60 = vadd.f32 %v753_v54, %v397_v56 }
  0xd2   :  { %v2063_v62 = vpop.f32.mrf.mxu0 }
  0xd3   :  { %v2754_v0 = vpack.c.bf16 %v940_v59, %v939_v57  ;;  %v938_v1 = vmax.f32 %v906_v60, 0.0  ;;  %v911_v6 = vadd.f32 %v2063_v62, %v778_v14 }
  0xd4   :  { %v410_v4 = vpop.f32.mrf.mxu0 }
  0xd5   :  { %v2756_v5 = vpack.c.bf16 %v938_v1, %v937_v63  ;;  %v909_v9 = vadd.f32 %v768_v28, %v410_v4  ;;  %v943_v13 = vmax.f32 %v911_v6, 0.0 }
  0xd6   :  { %v2064_v7 = vpop.f32.mrf.mxu0 }
  0xd7   :  { %v912_v10 = vadd.f32 %v2064_v7, %v783_v17  ;;  %v941_v19 = vmax.f32 %v909_v9, 0.0 }
  0xd8   :  { %v413_v12 = vpop.f32.mrf.mxu0 }
  0xd9   :  { %v944_v15 = vmax.f32 %v912_v10, 0.0  ;;  %v910_v16 = vadd.f32 %v773_v29, %v413_v12 }
  0xda   :  { %v2067_v18 = vpop.f32.mrf.mxu0 }
  0xdb   :  { %v2758_v21 = vpack.c.bf16 %v944_v15, %v943_v13  ;;  %v942_v22 = vmax.f32 %v910_v16, 0.0 }
  0xdc   :  { %v2760_v24 = vpop.f32.mrf.mxu0 }
  0xdd   :  { %v2762_v27 = vpack.c.bf16 %v942_v22, %v941_v19 }
  0xde   :  { %v2068_v32 = vpop.f32.mrf.mxu0 }
  0xe0   :  { %v429_v33 = vpop.f32.mrf.mxu0 }
  0xe2   :  { %v2071_v38 = vpop.f32.mrf.mxu0 }
  0xe3   :  { %v919_v1 = vadd.f32 %v2071_v38, %v2561_v26 }
  0xe4   :  { %v442_v14 = vpop.f32.mrf.mxu0 }
  0xe5   :  { %v951_v19 = vmax.f32 %v919_v1, 0.0 }
  0xe6   :  { %v2072_v39 = vpop.f32.mrf.mxu0 }
  0xe7   :  { %v920_v60 = vadd.f32 %v2072_v39, %v2576_v31 }
  0xe8   :  { %v445_v28 = vpop.f32.mrf.mxu0 }
  0xe9   :  { %v952_v9 = vmax.f32 %v920_v60, 0.0  ;;  %v918_v10 = vadd.f32 %v2604_v41, %v445_v28 }
  0xea   :  { %v2764_v17 = vpop.f32.mrf.mxu0 }
  0xeb   :  { %v976_v39 = vpack.c.bf16 %v952_v9, %v951_v19  ;;  %v2191_v9 = vld [vmem:[%s3192_s2 + $0x54] ss:$8 sps:$4 sm:$0xff]   ;;  %v2202_v19 = vld [vmem:[%s3192_s2 + $0x80] ss:$8 sps:$4 sm:$0xff]  }
  0xec   :  { %v2766_v43 = vpop.f32.mrf.mxu0 }
  0xee   :  { %v2768_v29 = vpop.f32.mrf.mxu0 }
  0xf0   :  { %v2770_v45 = vpop.f32.mrf.mxu0 }
  0xf2   :  { %v2079_v47 = vpop.f32.mrf.mxu0 }
  0xf4   :  { %v2772_v48 = vpop.f32.mrf.mxu0 }
  0xf6   :  { %v2080_v50 = vpop.f32.mrf.mxu0 }
  0xf8   :  { %v477_v51 = vpop.f32.mrf.mxu0 }
  0xfa   :  { %v2083_v53 = vpop.f32.mrf.mxu0 }
  0xfb   :  { %v931_v26 = vadd.f32 %v2083_v53, %v2618_v46  ;;  %v928_v53 = vadd.f32 %v2080_v50, %v2703_v11 }
  0xfc   :  { %v490_v54 = vpop.f32.mrf.mxu0 }
  0xfd   :  { %v929_v46 = vadd.f32 %v2654_v58, %v490_v54 }
  0xfe   :  { %v2084_v56 = vpop.f32.mrf.mxu0 }
  0xff   :  { %v932_v13 = vadd.f32 %v2084_v56, %v2627_v49 }
 0x100   :  { %v493_v57 = vpop.f32.mrf.mxu0 }
 0x101   :  { %v964_v41 = vmax.f32 %v932_v13, 0.0  ;;  %v930_v28 = vadd.f32 %v2662_v61, %v493_v57  ;;  %v2196_v13 = vld [vmem:[%s3192_s2 + $0x60] ss:$8 sps:$4 sm:$0xff]  }
 0x102   :  { %v2087_v59 = vpop.f32.mrf.mxu0 }
 0x103   :  { %v935_v63 = vadd.f32 %v2087_v59, %v2559_v25  ;;  %v917_v25 = vadd.f32 %v2602_v40, %v442_v14  ;;  %v950_v59 = vmax.f32 %v918_v10, 0.0  ;;  %v963_v40 = vmax.f32 %v931_v26, 0.0  ;;  %v2193_v10 = vld [vmem:[%s3192_s2 + $0x50] ss:$8 sps:$4 sm:$0xff]  }
 0x104   :  { %v506_v62 = vpop.f32.mrf.mxu0  ;;  %v962_v57 = vmax.f32 %v930_v28, 0.0  ;;  %v2205_v26 = vld [vmem:[%s3192_s2 + $0x90] ss:$8 sps:$4 sm:$0xff]  }
 0x105   :  { %v933_v6 = vadd.f32 %v2587_v35, %v506_v62  ;;  %v967_v15 = vmax.f32 %v935_v63, 0.0  ;;  %v949_v56 = vmax.f32 %v917_v25, 0.0  ;;  %v982_v61 = vpack.c.bf16 %v964_v41, %v963_v40  ;;  %v2203_v25 = vld [vmem:[%s3192_s2 + $0x94] ss:$8 sps:$4 sm:$0xff]  }
 0x106   :  { %v2088_v4 = vpop.f32.mrf.mxu0  ;;  %v961_v62 = vmax.f32 %v929_v46, 0.0  ;;  %v960_v63 = vmax.f32 %v928_v53, 0.0  ;;  %v2215_v41 = vld [vmem:[%s3192_s2 + $0xd4] ss:$8 sps:$4 sm:$0xff]  }
 0x107   :  { %v936_v7 = vadd.f32 %v2088_v4, %v2574_v30  ;;  %v965_v22 = vmax.f32 %v933_v6, 0.0  ;;  %v916_v30 = vadd.f32 %v2068_v32, %v2644_v55  ;;  %v914_v55 = vadd.f32 %v2680_v3, %v429_v33 }
 0x108   :  { %v509_v12 = vpop.f32.mrf.mxu0  ;;  %v975_v32 = vpack.c.bf16 %v950_v59, %v949_v56  ;;  %v926_v3 = vadd.f32 %v2732_v23, %v477_v51  ;;  %v981_v33 = vpack.c.bf16 %v962_v57, %v961_v62  ;;  %v923_v23 = vadd.f32 %v2764_v17, %v2746_v34  ;;  %v2214_v59 = vld [vmem:[%s3192_s2 + $0xc0] ss:$8 sps:$4 sm:$0xff]   ;;  %v2218_v56 = vld [vmem:[%s3192_s2 + $0xe4] ss:$8 sps:$4 sm:$0xff]  }
 0x109   :  { %v968_v16 = vmax.f32 %v936_v7, 0.0  ;;  %v934_v31 = vadd.f32 %v2589_v36, %v509_v12  ;;  %v915_v36 = vadd.f32 %v2067_v18, %v2636_v52  ;;  %v948_v14 = vmax.f32 %v916_v30, 0.0  ;;  %v2190_v7 = vld [vmem:[%s3192_s2 + $0x40] ss:$8 sps:$4 sm:$0xff]   ;;  %v2194_v12 = vld [vmem:[%s3192_s2 + $0x64] ss:$8 sps:$4 sm:$0xff]  }
 0x10a   :  { %v913_v52 = vadd.f32 %v2677_v2, %v2760_v24  ;;  %v927_v18 = vadd.f32 %v2079_v47, %v2694_v8  ;;  %v946_v54 = vmax.f32 %v914_v55, 0.0  ;;  %v925_v2 = vadd.f32 %v2724_v20, %v2772_v48  ;;  %v2211_v30 = vld [vmem:[%s3192_s2 + $0xb0] ss:$8 sps:$4 sm:$0xff]   ;;  %v2221_v55 = vld [vmem:[%s3192_s2 + $0xf4] ss:$8 sps:$4 sm:$0xff]  }
 0x10b   :  { %v984_v38 = vpack.c.bf16 %v968_v16, %v967_v15  ;;  %v966_v35 = vmax.f32 %v934_v31, 0.0  ;;  %v947_v60 = vmax.f32 %v915_v36, 0.0  ;;  %v924_v8 = vadd.f32 %v2768_v29, %v2748_v37  ;;  %v2197_v15 = vld [vmem:[%s3192_s2 + $0x74] ss:$8 sps:$4 sm:$0xff]   ;;  %v2199_v16 = vld [vmem:[%s3192_s2 + $0x70] ss:$8 sps:$4 sm:$0xff]  }
 0x10c   :  { %v945_v11 = vmax.f32 %v913_v52, 0.0  ;;  %v959_v50 = vmax.f32 %v927_v18, 0.0  ;;  %v958_v1 = vmax.f32 %v926_v3, 0.0  ;;  %v957_v51 = vmax.f32 %v925_v2, 0.0  ;;  %v2200_v31 = vld [vmem:[%s3192_s2 + $0x84] ss:$8 sps:$4 sm:$0xff]  }
 0x10d   :  { %v983_v49 = vpack.c.bf16 %v966_v35, %v965_v22  ;;  %1941 = vmatprep.subr.bf16.mxu0 %v984_v38  ;;  %2121 = vmatprep.subr.bf16.mxu1 %v984_v38  ;;  %v974_v58 = vpack.c.bf16 %v948_v14, %v947_v60  ;;  %v956_v4 = vmax.f32 %v924_v8, 0.0  ;;  %v922_v20 = vadd.f32 %v2752_v44, %v2770_v45  ;;  %v2188_v45 = vld [vmem:[%s3192_s2 + $0x44] ss:$8 sps:$4 sm:$0xff]   ;;  %v2208_v38 = vld [vmem:[%s3192_s2 + $0xa0] ss:$8 sps:$4 sm:$0xff]  }
 0x10e   :  { %1942 = vmatpush3.bf16.msra.mxu0 %v976_v39  ;;  %2129 = vmatpush3.bf16.msra.mxu1 %v976_v39  ;;  %v973_v24 = vpack.c.bf16 %v946_v54, %v945_v11  ;;  %v980_v47 = vpack.c.bf16 %v960_v63, %v959_v50  ;;  %v979_v48 = vpack.c.bf16 %v958_v1, %v957_v51  ;;  %v955_v37 = vmax.f32 %v923_v23, 0.0  ;;  %v2206_v22 = vld [vmem:[%s3192_s2 + $0xa4] ss:$8 sps:$4 sm:$0xff]   ;;  %v2209_v35 = vld [vmem:[%s3192_s2 + $0xb4] ss:$8 sps:$4 sm:$0xff]   ;;  %v2928_v63 = vpop.permute.xlu1 %1345 }
 0x10f   :  { %1943 = vmatprep.subr.bf16.mxu0 %v983_v49  ;;  %2122 = vmatprep.subr.bf16.mxu1 %v983_v49  ;;  %v921_v29 = vadd.f32 %v2750_v42, %v2766_v43  ;;  %v954_v34 = vmax.f32 %v922_v20, 0.0  ;;  %v2176_v42 = vld [vmem:[%s3192_s2 + $0x10] ss:$8 sps:$4 sm:$0xff]   ;;  %v2185_v43 = vld [vmem:[%s3192_s2 + $0x34] ss:$8 sps:$4 sm:$0xff]  }
 0x110   :  { %v978_v6 = vpack.c.bf16 %v956_v4, %v955_v37  ;;  %v2212_v39 = vld [vmem:[%s3192_s2 + $0xc4] ss:$8 sps:$4 sm:$0xff]   ;;  %v2887_v28 = vpop.f32.mrf.mxu0  ;;  %v2217_v36 = vld [vmem:[%s3192_s2 + $0xd0] ss:$8 sps:$4 sm:$0xff]   ;;  %v2220_v14 = vld [vmem:[%s3192_s2 + $0xe0] ss:$8 sps:$4 sm:$0xff]  }
 0x111   :  { %v953_v17 = vmax.f32 %v921_v29, 0.0 }
 0x112   :  { %1944 = vmatpush3.bf16.msra.mxu0 %v975_v32  ;;  %2130 = vmatpush3.bf16.msra.mxu1 %v975_v32  ;;  %v2889_v49 = vpop.f32.mrf.mxu0  ;;  %v2934_v11 = vpop.permute.xlu1 %1355 }
 0x113   :  { %1945 = vmatprep.subr.bf16.mxu0 %v982_v61  ;;  %2123 = vmatprep.subr.bf16.mxu1 %v982_v61  ;;  %v977_v44 = vpack.c.bf16 %v954_v34, %v953_v17  ;;  %v2223_v61 = vld [vmem:[%s3192_s2 + $0xf0] ss:$8 sps:$4 sm:$0xff]  }
 0x114   :  { %v2897_v40 = vpop.f32.mrf.mxu0 }
 0x116   :  { %1946 = vmatpush3.bf16.msra.mxu0 %v974_v58  ;;  %2131 = vmatpush3.bf16.msra.mxu1 %v974_v58  ;;  %v2899_v46 = vpop.f32.mrf.mxu0  ;;  %v2924_v58 = vpop.permute.xlu0 %1340 }
 0x117   :  { %1947 = vmatprep.subr.bf16.mxu0 %v981_v33  ;;  %2124 = vmatprep.subr.bf16.mxu1 %v981_v33  ;;  %v2942_v8 = vpop.permute.xlu1 %1365 }
 0x118   :  { %v2907_v32 = vpop.f32.mrf.mxu0 }
 0x11a   :  { %1948 = vmatpush3.bf16.msra.mxu0 %v973_v24  ;;  %2132 = vmatpush3.bf16.msra.mxu1 %v973_v24  ;;  %v2909_v53 = vpop.f32.mrf.mxu0  ;;  %v2930_v3 = vpop.permute.xlu0 %1350 }
 0x11b   :  { %1949 = vmatprep.subr.bf16.mxu0 %v980_v47  ;;  %2125 = vmatprep.subr.bf16.mxu1 %v980_v47  ;;  %v2948_v23 = vpop.permute.xlu1 %1375 }
 0x11c   :  { %v2914_v57 = vpop.f32.mrf.mxu0 }
 0x11e   :  { %1950 = vmatpush3.bf16.msra.mxu0 %v2758_v21  ;;  %2133 = vmatpush3.bf16.msra.mxu1 %v2758_v21  ;;  %v2179_v21 = vld [vmem:[%s3192_s2] ss:$8 sps:$4 sm:$0xff]   ;;  %v2916_v60 = vpop.f32.mrf.mxu0  ;;  %v2938_v2 = vpop.permute.xlu0 %1360 }
 0x11f   :  { %1951 = vmatprep.subr.bf16.mxu0 %v979_v48  ;;  %2126 = vmatprep.subr.bf16.mxu1 %v979_v48  ;;  %v2956_v48 = vpop.permute.xlu1 %1385 }
 0x120   :  { %v2918_v52 = vpop.f32.mrf.mxu0 }
 0x122   :  { %1952 = vmatpush3.bf16.msra.mxu0 %v2762_v27  ;;  %2134 = vmatpush3.bf16.msra.mxu1 %v2762_v27  ;;  %v2182_v27 = vld [vmem:[%s3192_s2 + $0x24] ss:$8 sps:$4 sm:$0xff]   ;;  %v2920_v18 = vpop.f32.mrf.mxu0  ;;  %v2944_v47 = vpop.permute.xlu0 %1370 }
 0x123   :  { %1953 = vmatprep.subr.bf16.mxu0 %v978_v6  ;;  %2127 = vmatprep.subr.bf16.mxu1 %v978_v6  ;;  %v2962_v6 = vpop.permute.xlu1 %1395 }
 0x124   :  { %v2922_v62 = vpop.f32.mrf.mxu0  ;;  %3204 = vst [vmem:[#allocation14_spill] sm:$0xff] %v2962_v6 }
 0x126   :  { %1954 = vmatpush3.bf16.msra.mxu0 %v2754_v0  ;;  %2135 = vmatpush3.bf16.msra.mxu1 %v2754_v0  ;;  %v2184_v0 = vld [vmem:[%s3192_s2 + $0x20] ss:$8 sps:$4 sm:$0xff]   ;;  %v2926_v54 = vpop.f32.mrf.mxu0  ;;  %v2952_v4 = vpop.permute.xlu0 %1380 }
 0x127   :  { %1955 = vmatprep.subr.bf16.mxu0 %v977_v44  ;;  %2128 = vmatprep.subr.bf16.mxu1 %v977_v44 }
 0x128   :  { %v2932_v33 = vpop.f32.mrf.mxu0 }
 0x129   :  { %3196 = vst [vmem:[#allocation6_spill] sm:$0xff] %v2932_v33 }
 0x12a   :  { %1956 = vmatpush3.bf16.msra.mxu0 %v2756_v5  ;;  %2136 = vmatpush3.bf16.msra.mxu1 %v2756_v5  ;;  %v2187_v5 = vld [vmem:[%s3192_s2 + $0x30] ss:$8 sps:$4 sm:$0xff]   ;;  %v2936_v50 = vpop.f32.mrf.mxu0  ;;  %v2958_v37 = vpop.permute.xlu0 %1390 }
 0x12b   :  { %3197 = vst [vmem:[#allocation7_spill] sm:$0xff] %v2936_v50  ;;  %3202 = vst [vmem:[#allocation12_spill] sm:$0xff] %v2958_v37 }
 0x12c   :  { %v2940_v24 = vpop.f32.mrf.mxu0 }
 0x12d   :  { %1210 = vmatmul.mubr.bf16.vlgmr.msra.gmra.mxu0 %v2179_v21  ;;  %1218 = vmatmul.mubr.bf16.vlgmr.msra.gmra.mxu1 %v2176_v42  ;;  %3198 = vst [vmem:[#allocation8_spill] sm:$0xff] %v2940_v24  ;;  %v2970_v42 = vpop.permute.xlu1 %1405 }
 0x12e   :  { %1225 = vmatprep.mubr.bf16.mxu1 %v2182_v27  ;;  %v2946_v1 = vpop.f32.mrf.mxu0  ;;  %v2966_v17 = vpop.permute.xlu0 %1400  ;;  %3208 = vst [vmem:[#allocation18_spill] sm:$0xff] %v2970_v42 }
 0x12f   :  { %3199 = vst [vmem:[#allocation9_spill] sm:$0xff] %v2946_v1  ;;  %3206 = vst [vmem:[#allocation16_spill] sm:$0xff] %v2966_v17 }
 0x130   :  { %v2950_v51 = vpop.f32.mrf.mxu0 }
 0x131   :  { %3200 = vst [vmem:[#allocation10_spill] sm:$0xff] %v2950_v51 }
 0x132   :  { %v2954_v20 = vpop.f32.mrf.mxu0  ;;  %v2972_v21 = vpop.permute.xlu0 %1410 }
 0x133   :  { %3201 = vst [vmem:[#allocation11_spill] sm:$0xff] %v2954_v20  ;;  %3209 = vst [vmem:[#allocation19_spill] sm:$0xff] %v2972_v21 }
 0x134   :  { %v2960_v29 = vpop.f32.mrf.mxu0 }
 0x135   :  { %1226 = vmatmul.mubr.bf16.gmra.mxu1 %v2184_v0  ;;  %3203 = vst [vmem:[#allocation13_spill] sm:$0xff] %v2960_v29  ;;  %v2976_v0 = vpop.permute.xlu1 %1415 }
 0x136   :  { %1233 = vmatprep.mubr.bf16.mxu1 %v2185_v43  ;;  %v2964_v34 = vpop.f32.mrf.mxu0  ;;  %3211 = vst [vmem:[#allocation21_spill] sm:$0xff] %v2976_v0 }
 0x137   :  { %3205 = vst [vmem:[#allocation15_spill] sm:$0xff] %v2964_v34 }
 0x138   :  { %v2968_v44 = vpop.f32.mrf.mxu0 }
 0x139   :  { %3207 = vst [vmem:[#allocation17_spill] sm:$0xff] %v2968_v44 }
 0x13a   :  { %v2974_v27 = vpop.f32.mrf.mxu0 }
 0x13b   :  { %3210 = vst [vmem:[#allocation20_spill] sm:$0xff] %v2974_v27 }
 0x13c   :  { %v2978_v43 = vpop.f32.mrf.mxu0 }
 0x13d   :  { %1234 = vmatmul.mubr.bf16.gmra.mxu1 %v2187_v5  ;;  %3212 = vst [vmem:[#allocation22_spill] sm:$0xff] %v2978_v43  ;;  %v2980_v5 = vpop.permute.xlu0 %1420 }
 0x13e   :  { %1241 = vmatprep.mubr.bf16.mxu1 %v2188_v45  ;;  %3213 = vst [vmem:[#allocation23_spill] sm:$0xff] %v2980_v5  ;;  %v2982_v45 = vpop.f32.mrf.mxu0 }
 0x13f   :  { %3214 = vst [vmem:[#allocation24_spill] sm:$0xff] %v2982_v45 }
 0x145   :  { %1242 = vmatmul.mubr.bf16.gmra.mxu1 %v2190_v7  ;;  %v2984_v7 = vpop.permute.xlu1 %1425 }
 0x146   :  { %1249 = vmatprep.mubr.bf16.mxu1 %v2191_v9  ;;  %3215 = vst [vmem:[#allocation25_spill] sm:$0xff] %v2984_v7  ;;  %v2986_v9 = vpop.permute.xlu0 %1430 }
 0x147   :  { %3216 = vst [vmem:[#allocation26_spill] sm:$0xff] %v2986_v9 }
 0x14d   :  { %1250 = vmatmul.mubr.bf16.gmra.mxu1 %v2193_v10  ;;  %v2988_v10 = vpop.f32.mrf.mxu0 }
 0x14e   :  { %1257 = vmatprep.mubr.bf16.mxu1 %v2194_v12  ;;  %3217 = vst [vmem:[#allocation27_spill] sm:$0xff] %v2988_v10  ;;  %v2990_v12 = vpop.permute.xlu1 %1435 }
 0x14f   :  { %3218 = vst [vmem:[#allocation28_spill] sm:$0xff] %v2990_v12 }
 0x155   :  { %1258 = vmatmul.mubr.bf16.gmra.mxu1 %v2196_v13  ;;  %v2992_v13 = vpop.f32.mrf.mxu0 }
 0x156   :  { %1265 = vmatprep.mubr.bf16.mxu1 %v2197_v15  ;;  %3219 = vst [vmem:[#allocation29_spill] sm:$0xff] %v2992_v13  ;;  %v2994_v15 = vpop.permute.xlu0 %1440 }
 0x157   :  { %3220 = vst [vmem:[#allocation30_spill] sm:$0xff] %v2994_v15 }
 0x15d   :  { %1266 = vmatmul.mubr.bf16.gmra.mxu1 %v2199_v16  ;;  %v2996_v16 = vpop.f32.mrf.mxu0 }
 0x15e   :  { %1273 = vmatprep.mubr.bf16.mxu1 %v2200_v31  ;;  %3221 = vst [vmem:[#allocation31_spill] sm:$0xff] %v2996_v16  ;;  %v2998_v31 = vpop.permute.xlu1 %1445 }
 0x15f   :  { %3222 = vst [vmem:[#allocation32_spill] sm:$0xff] %v2998_v31 }
 0x165   :  { %1274 = vmatmul.mubr.bf16.gmra.mxu1 %v2202_v19 }
 0x166   :  { %1281 = vmatprep.mubr.bf16.mxu1 %v2203_v25  ;;  %v3000_v25 = vpop.permute.xlu0 %1450 }
 0x167   :  { %3223 = vst [vmem:[#allocation33_spill] sm:$0xff] %v3000_v25 }
 0x16d   :  { %1282 = vmatmul.mubr.bf16.gmra.mxu1 %v2205_v26 }
 0x16e   :  { %1289 = vmatprep.mubr.bf16.mxu1 %v2206_v22  ;;  %v3002_v22 = vpop.f32.mrf.mxu0 }
 0x16f   :  { %3224 = vst [vmem:[#allocation34_spill] sm:$0xff] %v3002_v22 }
 0x175   :  { %1290 = vmatmul.mubr.bf16.gmra.mxu1 %v2208_v38 }
 0x176   :  { %1297 = vmatprep.mubr.bf16.mxu1 %v2209_v35  ;;  %v3004_v35 = vpop.permute.xlu1 %1455 }
 0x177   :  { %3225 = vst [vmem:[#allocation35_spill] sm:$0xff] %v3004_v35 }
 0x17d   :  { %1298 = vmatmul.mubr.bf16.gmra.mxu1 %v2211_v30 }
 0x17e   :  { %1305 = vmatprep.mubr.bf16.mxu1 %v2212_v39  ;;  %v3006_v39 = vpop.f32.mrf.mxu0 }
 0x17f   :  { %3226 = vst [vmem:[#allocation36_spill] sm:$0xff] %v3006_v39 }
 0x185   :  { %1306 = vmatmul.mubr.bf16.gmra.mxu1 %v2214_v59  ;;  %v3008_v59 = vpop.permute.xlu0 %1460 }
 0x186   :  { %1313 = vmatprep.mubr.bf16.mxu1 %v2215_v41  ;;  %3227 = vst [vmem:[#allocation37_spill] sm:$0xff] %v3008_v59 }
 0x18d   :  { %1314 = vmatmul.mubr.bf16.gmra.mxu1 %v2217_v36 }
 0x18e   :  { %1321 = vmatprep.mubr.bf16.mxu1 %v2218_v56  ;;  %v3010_v56 = vpop.f32.mrf.mxu0 }
 0x18f   :  { %3228 = vst [vmem:[#allocation38_spill] sm:$0xff] %v3010_v56 }
 0x190   :  { %v3016_v10 = vpop.f32.mrf.mxu0 }
 0x191   :  { %3231 = vst [vmem:[#allocation41_spill] sm:$0xff] %v3016_v10 }
 0x192   :  { %v3020_v25 = vpop.f32.mrf.mxu0 }
 0x193   :  { %3233 = vst [vmem:[#allocation43_spill] sm:$0xff] %v3020_v25 }
 0x195   :  { %1322 = vmatmul.mubr.bf16.gmra.mxu1 %v2220_v14  ;;  %v3012_v14 = vpop.permute.xlu1 %1465 }
 0x196   :  { %1329 = vmatprep.mubr.bf16.mxu1 %v2221_v55  ;;  %3229 = vst [vmem:[#allocation39_spill] sm:$0xff] %v3012_v14 }
 0x199   :  { %v3018_v13 = vpop.permute.xlu1 %1475 }
 0x19a   :  { %3232 = vst [vmem:[#allocation42_spill] sm:$0xff] %v3018_v13 }
 0x19d   :  { %1330 = vmatmul.mubr.bf16.gmra.mxu1 %v2223_v61  ;;  %v3014_v61 = vpop.permute.xlu0 %1470  ;;  %v1565_v56 = vpop.permute.xlu1 %1564 }
 0x19e   :  { %3230 = vst [vmem:[#allocation40_spill] sm:$0xff] %v3014_v61 }
 0x1a1   :  { %v3022_v39 = vpop.permute.xlu0 %1480  ;;  %v1575_v12 = vpop.permute.xlu1 %1574 }
 0x1a2   :  { %3234 = vst [vmem:[#allocation44_spill] sm:$0xff] %v3022_v39 }
 0x1a5   :  { %v1570_v14 = vpop.permute.xlu0 %1569  ;;  %v3030_v39 = vpop.permute.xlu1 %1584 }
 0x1a9   :  { %v1580_v9 = vpop.permute.xlu0 %1579  ;;  %v3040_v21 = vpop.permute.xlu1 %1594 }
 0x1ad   :  { %v3034_v51 = vpop.permute.xlu0 %1589 }
 0x1b1   :  { %v3045_v17 = vpop.permute.xlu0 %1599 }
 0x1b2   :  { %3235 = vst [vmem:[#allocation45_spill] sm:$0xff] %v3045_v17 }
 0x1ed   :  { %v1963_v19 = vpop.f32.mrf.mxu1  ;;  %v1957_v31 = vpop.f32.mrf.mxu0 }
 0x1ef   :  { %v1964_v26 = vpop.f32.mrf.mxu1  ;;  %v1958_v45 = vpop.f32.mrf.mxu0 }
 0x1f0   :  { %v1959_v0 = vadd.f32 %v1958_v45, %v1957_v31  ;;  %v1965_v33 = vadd.f32 %v1964_v26, %v1963_v19  ;;  %v3054_v31 = vpop.permute.xlu1 %1604  ;;  %v3059_v19 = vpop.permute.xlu0 %1609 }
 0x1f1   :  { %v1966_v38 = vpop.f32.mrf.mxu1  ;;  %v1960_v27 = vpop.f32.mrf.mxu0  ;;  %3236 = vst [vmem:[#allocation46_spill] sm:$0xff] %v3059_v19 }
 0x1f2   :  { %v1212_v1 = vadd.f32 %v1959_v0, %v2889_v49  ;;  %v1220_v45 = vadd.f32 %v2887_v28, %v1965_v33 }
 0x1f3   :  { %v1967_v30 = vpop.f32.mrf.mxu1  ;;  %v1961_v25 = vpop.f32.mrf.mxu0 }
 0x1f4   :  { %v1962_v5 = vadd.f32 %v1961_v25, %v1960_v27  ;;  %v1498_v50 = vadd.f32 %v2924_v58, %v1212_v1  ;;  %v1500_v49 = vadd.f32 %v2930_v3, %v1220_v45  ;;  %v3067_v28 = vpop.permute.xlu1 %1614 }
 0x1f5   :  { %v1969_v41 = vpop.f32.mrf.mxu1 }
 0x1f6   :  { %v1215_v24 = vadd.f32 %v1962_v5, %v2899_v46  ;;  %v1968_v46 = vadd.f32 %v1967_v30, %v1966_v38  ;;  %v1530_v0 = vmax.f32 %v1498_v50, 0.0  ;;  %v1532_v38 = vmax.f32 %v1500_v49, 0.0  ;;  %v3071_v30 = vpop.permute.xlu0 %1619 }
 0x1f7   :  { %v1970_v36 = vpop.f32.mrf.mxu1 }
 0x1f8   :  { %v1499_v27 = vadd.f32 %v2928_v63, %v1215_v24  ;;  %v1223_v63 = vadd.f32 %v2897_v40, %v1968_v46  ;;  %v1971_v24 = vadd.f32 %v1970_v36, %v1969_v41 }
 0x1f9   :  { %v1972_v55 = vpop.f32.mrf.mxu1 }
 0x1fa   :  { %v1531_v26 = vmax.f32 %v1499_v27, 0.0  ;;  %v1722_v27 = vmul.f32 %v1565_v56, %v1530_v0  ;;  %v1501_v19 = vadd.f32 %v2934_v11, %v1223_v63  ;;  %v1228_v3 = vadd.f32 %v1971_v24, %v2909_v53  ;;  %v3084_v53 = vpop.permute.xlu0 %1629 }
 0x1fb   :  { %v1973_v16 = vpop.f32.mrf.mxu1 }
 0x1fc   :  { %v1723_v33 = vmul.f32 %v1570_v14, %v1531_v26  ;;  %v1974_v58 = vadd.f32 %v1973_v16, %v1972_v55  ;;  %v1724_v14 = vmul.f32 %v1575_v12, %v1532_v38  ;;  %v3078_v16 = vpop.permute.xlu1 %1624  ;;  %v1533_v55 = vmax.f32 %v1501_v19, 0.0 }
 0x1fd   :  { %v1975_v22 = vpop.f32.mrf.mxu1  ;;  %v1502_v26 = vadd.f32 %v2938_v2, %v1228_v3 }
 0x1fe   :  { %v1754_v40 = vadd.f32 %v1723_v33, %v1722_v27  ;;  %v1231_v41 = vadd.f32 %v1974_v58, %v2916_v60 }
 0x1ff   :  { %v1976_v35 = vpop.f32.mrf.mxu1  ;;  %v1534_v0 = vmax.f32 %v1502_v26, 0.0 }
 0x200   :  { %v1977_v50 = vadd.f32 %v1976_v35, %v1975_v22  ;;  %v1755_v22 = vadd.f32 %v1754_v40, %v1724_v14  ;;  %v1503_v35 = vadd.f32 %v2942_v8, %v1231_v41  ;;  %v3237_v40 = vld [vmem:[#allocation12_spill] sm:$0xff] }
 0x201   :  { %v1978_v59 = vpop.f32.mrf.mxu1 }
 0x202   :  { %v1236_v56 = vadd.f32 %v2907_v32, %v1977_v50  ;;  %v1535_v24 = vmax.f32 %v1503_v35, 0.0 }
 0x203   :  { %v1979_v43 = vpop.f32.mrf.mxu1 }
 0x204   :  { %v1980_v36 = vadd.f32 %v1979_v43, %v1978_v59  ;;  %v1725_v59 = vmul.f32 %v1580_v9, %v1533_v55  ;;  %v1504_v19 = vadd.f32 %v2944_v47, %v1236_v56  ;;  %v1727_v38 = vmul.f32 %v3034_v51, %v1535_v24  ;;  %v3241_v56 = vld [vmem:[#allocation9_spill] sm:$0xff]  ;;  %v3244_v24 = vld [vmem:[#allocation46_spill] sm:$0xff] }
 0x205   :  { %v1981_v44 = vpop.f32.mrf.mxu1 }
 0x206   :  { %v1239_v60 = vadd.f32 %v2914_v57, %v1980_v36  ;;  %v1756_v63 = vadd.f32 %v1755_v22, %v1725_v59  ;;  %v1536_v47 = vmax.f32 %v1504_v19, 0.0  ;;  %v3243_v59 = vld [vmem:[#allocation6_spill] sm:$0xff] }
 0x207   :  { %v1982_v15 = vpop.f32.mrf.mxu1 }
 0x208   :  { %v1983_v49 = vadd.f32 %v1982_v15, %v1981_v44  ;;  %v3093_v15 = vpop.permute.xlu1 %1634  ;;  %v1505_v8 = vadd.f32 %v2948_v23, %v1239_v60 }
 0x209   :  { %v3024_v61 = vpop.f32.mrf.mxu1 }
 0x20a   :  { %v1244_v2 = vadd.f32 %v1983_v49, %v2920_v18  ;;  %v1726_v18 = vmul.f32 %v3030_v39, %v1534_v0 }
 0x20b   :  { %v1985_v10 = vpop.f32.mrf.mxu1 }
 0x20c   :  { %v1986_v12 = vadd.f32 %v1985_v10, %v3024_v61  ;;  %v3099_v10 = vpop.permute.xlu0 %1639  ;;  %v1506_v61 = vadd.f32 %v2952_v4, %v1244_v2  ;;  %v1757_v23 = vadd.f32 %v1756_v63, %v1726_v18  ;;  %v3111_v3 = vpop.permute.xlu1 %1644  ;;  %v1728_v4 = vmul.f32 %v3040_v21, %v1536_v47 }
 0x20d   :  { %v3026_v13 = vpop.f32.mrf.mxu1 }
 0x20e   :  { %v1247_v33 = vadd.f32 %v1986_v12, %v2926_v54  ;;  %v1537_v54 = vmax.f32 %v1505_v8, 0.0 }
 0x20f   :  { %v3028_v29 = vpop.f32.mrf.mxu1 }
 0x210   :  { %v1989_v44 = vadd.f32 %v3028_v29, %v3026_v13  ;;  %v3118_v36 = vpop.permute.xlu0 %1649  ;;  %v3129_v2 = vpop.permute.xlu1 %1654 }
 0x211   :  { %v3032_v7 = vpop.f32.mrf.mxu1 }
 0x212   :  { %v1252_v13 = vadd.f32 %v2918_v52, %v1989_v44  ;;  %v1538_v52 = vmax.f32 %v1506_v61, 0.0 }
 0x213   :  { %v3036_v34 = vpop.f32.mrf.mxu1 }
 0x214   :  { %v1992_v9 = vadd.f32 %v3036_v34, %v3032_v7  ;;  %v1507_v34 = vadd.f32 %v2956_v48, %v1247_v33  ;;  %v1758_v48 = vadd.f32 %v1757_v23, %v1727_v38  ;;  %v1730_v35 = vmul.f32 %v3054_v31, %v1538_v52  ;;  %v3134_v31 = vpop.permute.xlu0 %1659  ;;  %v3248_v38 = vld [vmem:[#allocation11_spill] sm:$0xff] }
 0x215   :  { %v3038_v20 = vpop.f32.mrf.mxu1 }
 0x216   :  { %v1255_v7 = vadd.f32 %v2922_v62, %v1992_v9  ;;  %v3239_v62 = vld [vmem:[#allocation45_spill] sm:$0xff]  ;;  %v1759_v22 = vadd.f32 %v1758_v48, %v1728_v4  ;;  %v3245_v9 = vld [vmem:[#allocation18_spill] sm:$0xff] }
 0x217   :  { %v3043_v42 = vpop.f32.mrf.mxu1  ;;  %v1729_v14 = vmul.f32 %v3239_v62, %v1537_v54 }
 0x218   :  { %v1995_v58 = vadd.f32 %v3043_v42, %v3038_v20  ;;  %v1508_v20 = vadd.f32 %v3237_v40, %v1252_v13  ;;  %v3238_v42 = vld [vmem:[#allocation7_spill] sm:$0xff]  ;;  %v3249_v40 = vld [vmem:[#allocation21_spill] sm:$0xff] }
 0x219   :  { %v3048_v6 = vpop.f32.mrf.mxu1  ;;  %v1760_v44 = vadd.f32 %v1759_v22, %v1729_v14  ;;  %v3251_v14 = vld [vmem:[#allocation23_spill] sm:$0xff]  ;;  %v3253_v22 = vld [vmem:[#allocation25_spill] sm:$0xff] }
 0x21a   :  { %v1260_v41 = vadd.f32 %v1995_v58, %v3238_v42  ;;  %v1540_v12 = vmax.f32 %v1508_v20, 0.0  ;;  %v3142_v42 = vpop.permute.xlu1 %1664 }
 0x21b   :  { %v3051_v25 = vpop.f32.mrf.mxu1  ;;  %v1761_v47 = vadd.f32 %v1760_v44, %v1730_v35 }
 0x21c   :  { %v1998_v39 = vadd.f32 %v3051_v25, %v3048_v6  ;;  %v1539_v6 = vmax.f32 %v1507_v34, 0.0  ;;  %v3240_v25 = vld [vmem:[#allocation14_spill] sm:$0xff]  ;;  %v1732_v58 = vmul.f32 %v3067_v28, %v1540_v12 }
 0x21d   :  { %v3057_v5 = vpop.f32.mrf.mxu1  ;;  %v1509_v26 = vadd.f32 %v3240_v25, %v1255_v7 }
 0x21e   :  { %v1263_v21 = vadd.f32 %v1998_v39, %v3241_v56  ;;  %v1731_v8 = vmul.f32 %v3244_v24, %v1539_v6  ;;  %v3256_v24 = vld [vmem:[#allocation20_spill] sm:$0xff] }
 0x21f   :  { %v3061_v17 = vpop.f32.mrf.mxu1  ;;  %v1541_v33 = vmax.f32 %v1509_v26, 0.0 }
 0x220   :  { %v2001_v51 = vadd.f32 %v3061_v17, %v3057_v5  ;;  %v3242_v17 = vld [vmem:[#allocation16_spill] sm:$0xff]  ;;  %v1762_v39 = vadd.f32 %v1761_v47, %v1731_v8 }
 0x221   :  { %v3065_v37 = vpop.f32.mrf.mxu1  ;;  %v1510_v5 = vadd.f32 %v3242_v17, %v1260_v41  ;;  %v1733_v4 = vmul.f32 %v3071_v30, %v1541_v33  ;;  %v3250_v41 = vld [vmem:[#allocation15_spill] sm:$0xff] }
 0x222   :  { %v1268_v0 = vadd.f32 %v3243_v59, %v2001_v51  ;;  %v1763_v28 = vadd.f32 %v1762_v39, %v1732_v58 }
 0x223   :  { %v3069_v1 = vpop.f32.mrf.mxu1 }
 0x224   :  { %v2004_v49 = vadd.f32 %v3069_v1, %v3065_v37  ;;  %v1511_v37 = vadd.f32 %v3245_v9, %v1263_v21  ;;  %v3246_v1 = vld [vmem:[#allocation8_spill] sm:$0xff]  ;;  %v1764_v56 = vadd.f32 %v1763_v28, %v1733_v4 }
 0x225   :  { %v3075_v45 = vpop.f32.mrf.mxu1 }
 0x226   :  { %v1271_v18 = vadd.f32 %v3246_v1, %v2004_v49  ;;  %v1543_v52 = vmax.f32 %v1511_v37, 0.0  ;;  %v3257_v1 = vld [vmem:[#allocation28_spill] sm:$0xff] }
 0x227   :  { %v2006_v46 = vpop.f32.mrf.mxu1 }
 0x228   :  { %v2007_v19 = vadd.f32 %v2006_v46, %v3075_v45  ;;  %v1542_v45 = vmax.f32 %v1510_v5, 0.0  ;;  %v3247_v46 = vld [vmem:[#allocation19_spill] sm:$0xff]  ;;  %v1513_v20 = vadd.f32 %v3249_v40, %v1271_v18  ;;  %v1735_v21 = vmul.f32 %v3084_v53, %v1543_v52  ;;  %v3261_v52 = vld [vmem:[#allocation32_spill] sm:$0xff] }
 0x229   :  { %v3082_v11 = vpop.f32.mrf.mxu1  ;;  %v1512_v23 = vadd.f32 %v3247_v46, %v1268_v0  ;;  %v1675_v0 = vpop.permute.xlu1 %1674  ;;  %v3259_v46 = vld [vmem:[#allocation30_spill] sm:$0xff] }
 0x22a   :  { %v1276_v54 = vadd.f32 %v2007_v19, %v3248_v38  ;;  %v1734_v48 = vmul.f32 %v3078_v16, %v1542_v45  ;;  %v1545_v49 = vmax.f32 %v1513_v20, 0.0  ;;  %v3255_v19 = vld [vmem:[#allocation26_spill] sm:$0xff]  ;;  %v3260_v38 = vld [vmem:[#allocation17_spill] sm:$0xff] }
 0x22b   :  { %v2009_v43 = vpop.f32.mrf.mxu1  ;;  %v1544_v62 = vmax.f32 %v1512_v23, 0.0  ;;  %v3262_v20 = vld [vmem:[#allocation22_spill] sm:$0xff] }
 0x22c   :  { %v2010_v61 = vadd.f32 %v2009_v43, %v3082_v11  ;;  %v1514_v6 = vadd.f32 %v3251_v14, %v1276_v54  ;;  %v1765_v16 = vadd.f32 %v1764_v56, %v1734_v48  ;;  %v1737_v53 = vmul.f32 %v3099_v10, %v1545_v49 }
 0x22d   :  { %v2011_v32 = vpop.f32.mrf.mxu1  ;;  %v1736_v5 = vmul.f32 %v3093_v15, %v1544_v62  ;;  %v1685_v10 = vpop.permute.xlu1 %1684  ;;  %v3263_v62 = vld [vmem:[#allocation33_spill] sm:$0xff] }
 0x22e   :  { %v1279_v11 = vadd.f32 %v2010_v61, %v3250_v41  ;;  %v1546_v59 = vmax.f32 %v1514_v6, 0.0  ;;  %v1766_v33 = vadd.f32 %v1765_v16, %v1735_v21  ;;  %v3264_v6 = vld [vmem:[#allocation29_spill] sm:$0xff]  ;;  %v3265_v21 = vld [vmem:[#allocation35_spill] sm:$0xff] }
 0x22f   :  { %v2012_v57 = vpop.f32.mrf.mxu1  ;;  %v3267_v16 = vld [vmem:[#allocation37_spill] sm:$0xff] }
 0x230   :  { %v2013_v34 = vadd.f32 %v2012_v57, %v2011_v32  ;;  %v3147_v32 = vpop.permute.xlu0 %1669  ;;  %v3252_v57 = vld [vmem:[#allocation10_spill] sm:$0xff]  ;;  %v1515_v35 = vadd.f32 %v3253_v22, %v1279_v11  ;;  %v1767_v15 = vadd.f32 %v1766_v33, %v1736_v5  ;;  %v1738_v58 = vmul.f32 %v3111_v3, %v1546_v59 }
 0x231   :  { %v2014_v29 = vpop.f32.mrf.mxu1 }
 0x232   :  { %v1284_v25 = vadd.f32 %v3252_v57, %v2013_v34  ;;  %v1547_v37 = vmax.f32 %v1515_v35, 0.0  ;;  %v3266_v35 = vld [vmem:[#allocation34_spill] sm:$0xff] }
 0x233   :  { %v2015_v27 = vpop.f32.mrf.mxu1 }
 0x234   :  { %v2016_v43 = vadd.f32 %v2015_v27, %v2014_v29  ;;  %v3254_v29 = vld [vmem:[#allocation13_spill] sm:$0xff]  ;;  %v1516_v44 = vadd.f32 %v3255_v19, %v1284_v25  ;;  %v1680_v9 = vpop.permute.xlu0 %1679  ;;  %v1739_v39 = vmul.f32 %v3118_v36, %v1547_v37  ;;  %v3268_v19 = vld [vmem:[#allocation27_spill] sm:$0xff] }
 0x235   :  { %v2017_v50 = vpop.f32.mrf.mxu1 }
 0x236   :  { %v1287_v27 = vadd.f32 %v3254_v29, %v2016_v43  ;;  %v1548_v45 = vmax.f32 %v1516_v44, 0.0 }
 0x237   :  { %v2018_v55 = vpop.f32.mrf.mxu1 }
 0x238   :  { %v2019_v30 = vadd.f32 %v2018_v55, %v2017_v50  ;;  %v1517_v18 = vadd.f32 %v3257_v1, %v1287_v27  ;;  %v1690_v3 = vpop.permute.xlu0 %1689  ;;  %v1740_v28 = vmul.f32 %v3129_v2, %v1548_v45  ;;  %v1695_v27 = vpop.permute.xlu1 %1694  ;;  %v3270_v1 = vld [vmem:[#allocation31_spill] sm:$0xff] }
 0x239   :  { %v2020_v60 = vpop.f32.mrf.mxu1 }
 0x23a   :  { %v1292_v50 = vadd.f32 %v2019_v30, %v3256_v24  ;;  %v1549_v4 = vmax.f32 %v1517_v18, 0.0 }
 0x23b   :  { %v2021_v63 = vpop.f32.mrf.mxu1 }
 0x23c   :  { %v2022_v12 = vadd.f32 %v2021_v63, %v2020_v60  ;;  %v3258_v60 = vld [vmem:[#allocation24_spill] sm:$0xff]  ;;  %v1518_v23 = vadd.f32 %v3259_v46, %v1292_v50  ;;  %v1741_v36 = vmul.f32 %v3134_v31, %v1549_v4  ;;  %v1486_v50 = vpop.permute.xlu0 %1485  ;;  %v1700_v45 = vpop.permute.xlu1 %1699 }
 0x23d   :  { %v2023_v13 = vpop.f32.mrf.mxu1 }
 0x23e   :  { %v1295_v63 = vadd.f32 %v2022_v12, %v3258_v60  ;;  %v1550_v48 = vmax.f32 %v1518_v23, 0.0 }
 0x23f   :  { %v2024_v7 = vpop.f32.mrf.mxu1 }
 0x240   :  { %v2025_v55 = vadd.f32 %v2024_v7, %v2023_v13  ;;  %v1768_v7 = vadd.f32 %v1767_v15, %v1737_v53  ;;  %v1519_v40 = vadd.f32 %v3261_v52, %v1295_v63  ;;  %v1742_v2 = vmul.f32 %v3142_v42, %v1550_v48  ;;  %v3269_v53 = vld [vmem:[#allocation39_spill] sm:$0xff] }
 0x241   :  { %v2026_v51 = vpop.f32.mrf.mxu1 }
 0x242   :  { %v1300_v13 = vadd.f32 %v3260_v38, %v2025_v55  ;;  %v1769_v43 = vadd.f32 %v1768_v7, %v1738_v58  ;;  %v1551_v56 = vmax.f32 %v1519_v40, 0.0 }
 0x243   :  { %v2027_v26 = vpop.f32.mrf.mxu1 }
 0x244   :  { %v2028_v47 = vadd.f32 %v2027_v26, %v2026_v51  ;;  %v1520_v14 = vadd.f32 %v3263_v62, %v1300_v13  ;;  %v1770_v26 = vadd.f32 %v1769_v43, %v1739_v39  ;;  %v1743_v31 = vmul.f32 %v3147_v32, %v1551_v56  ;;  %v1491_v39 = vpop.permute.xlu0 %1490  ;;  %v3275_v62 = vld [vmem:[#allocation43_spill] sm:$0xff] }
 0x245   :  { %v2029_v17 = vpop.f32.mrf.mxu1 }
 0x246   :  { %v1303_v41 = vadd.f32 %v3262_v20, %v2028_v47  ;;  %v1771_v12 = vadd.f32 %v1770_v26, %v1740_v28 }
 0x247   :  { %v2030_v8 = vpop.f32.mrf.mxu1 }
 0x248   :  { %v2031_v54 = vadd.f32 %v2030_v8, %v2029_v17  ;;  %v1521_v49 = vadd.f32 %v3265_v21, %v1303_v41  ;;  %v1552_v17 = vmax.f32 %v1520_v14, 0.0  ;;  %v1772_v55 = vadd.f32 %v1771_v12, %v1741_v36  ;;  %v1705_v14 = vpop.permute.xlu1 %1704  ;;  %v1496_v56 = vpop.permute.xlu0 %1495 }
 0x249   :  { %v2032_v61 = vpop.f32.mrf.mxu1 }
 0x24a   :  { %v1308_v57 = vadd.f32 %v2031_v54, %v3264_v6  ;;  %v1553_v8 = vmax.f32 %v1521_v49, 0.0  ;;  %v1773_v60 = vadd.f32 %v1772_v55, %v1742_v2  ;;  %v1744_v63 = vmul.f32 %v1675_v0, %v1552_v17  ;;  %v3272_v54 = vld [vmem:[#allocation42_spill] sm:$0xff]  ;;  %v3274_v0 = vld [vmem:[#allocation44_spill] sm:$0xff] }
 0x24b   :  { %v2033_v34 = vpop.f32.mrf.mxu1 }
 0x24c   :  { %v2034_v51 = vadd.f32 %v2033_v34, %v2032_v61  ;;  %v1522_v5 = vadd.f32 %v3267_v16, %v1308_v57  ;;  %v3271_v61 = vld [vmem:[#allocation40_spill] sm:$0xff]  ;;  %v1774_v46 = vadd.f32 %v1773_v60, %v1743_v31  ;;  %v1745_v23 = vmul.f32 %v1680_v9, %v1553_v8  ;;  %v3273_v34 = vld [vmem:[#allocation38_spill] sm:$0xff] }
 0x24d   :  { %v2035_v11 = vpop.f32.mrf.mxu1 }
 0x24e   :  { %v1311_v29 = vadd.f32 %v2034_v51, %v3266_v35  ;;  %v1554_v42 = vmax.f32 %v1522_v5, 0.0  ;;  %v1775_v4 = vadd.f32 %v1774_v46, %v1744_v63  ;;  %v3276_v35 = vld [vmem:[#allocation36_spill] sm:$0xff]  ;;  %v1710_v5 = vpop.permute.xlu1 %1709 }
 0x24f   :  { %v2036_v25 = vpop.f32.mrf.mxu1 }
 0x250   :  { %v2037_v30 = vadd.f32 %v2036_v25, %v2035_v11  ;;  %v1523_v37 = vadd.f32 %v3269_v53, %v1311_v29  ;;  %v1746_v52 = vmul.f32 %v1685_v10, %v1554_v42  ;;  %v1776_v43 = vadd.f32 %v1775_v4, %v1745_v23 }
 0x251   :  { %v2038_v22 = vpop.f32.mrf.mxu1 }
 0x252   :  { %v1316_v44 = vadd.f32 %v3268_v19, %v2037_v30  ;;  %v1555_v13 = vmax.f32 %v1523_v37, 0.0  ;;  %v1777_v6 = vadd.f32 %v1776_v43, %v1746_v52  ;;  %v1720_v37 = vpop.permute.xlu1 %1719 }
 0x253   :  { %v2039_v59 = vpop.f32.mrf.mxu1 }
 0x254   :  { %v2040_v24 = vadd.f32 %v2039_v59, %v2038_v22  ;;  %v1524_v15 = vadd.f32 %v3271_v61, %v1316_v44  ;;  %v1747_v28 = vmul.f32 %v1690_v3, %v1555_v13 }
 0x255   :  { %v2041_v33 = vpop.f32.mrf.mxu1 }
 0x256   :  { %v1319_v18 = vadd.f32 %v3270_v1, %v2040_v24  ;;  %v1556_v20 = vmax.f32 %v1524_v15, 0.0  ;;  %v1778_v21 = vadd.f32 %v1777_v6, %v1747_v28 }
 0x257   :  { %v2042_v47 = vpop.f32.mrf.mxu1 }
 0x258   :  { %v2043_v58 = vadd.f32 %v2042_v47, %v2041_v33  ;;  %v1525_v32 = vadd.f32 %v3272_v54, %v1319_v18  ;;  %v1748_v25 = vmul.f32 %v1695_v27, %v1556_v20  ;;  %v3277_v27 = vld [vmem:[#allocation41_spill] sm:$0xff] }
 0x259   :  { %v2044_v38 = vpop.f32.mrf.mxu1 }
 0x25a   :  { %v1324_v7 = vadd.f32 %v2043_v58, %v3273_v34  ;;  %v1557_v48 = vmax.f32 %v1525_v32, 0.0  ;;  %v1779_v2 = vadd.f32 %v1778_v21, %v1748_v25  ;;  %v1792_v58 = vstv %s3194_s4 }
 0x25b   :  { %v2045_v40 = vpop.f32.mrf.mxu1 }
 0x25c   :  { %v1526_v41 = vadd.f32 %v3274_v0, %v1324_v7  ;;  %v2046_v11 = vadd.f32 %v2045_v40, %v2044_v38  ;;  %v1749_v49 = vmul.f32 %v1700_v45, %v1557_v48 }
 0x25d   :  { %v2047_v51 = vpop.f32.mrf.mxu1 }
 0x25e   :  { %v1327_v9 = vadd.f32 %v2046_v11, %v3275_v62  ;;  %v1558_v30 = vmax.f32 %v1526_v41, 0.0  ;;  %v1780_v59 = vadd.f32 %v1779_v2, %v1749_v49 }
 0x25f   :  { %v2048_v57 = vpop.f32.mrf.mxu1 }
 0x260   :  { %v1527_v26 = vadd.f32 %v1486_v50, %v1327_v9  ;;  %v2049_v36 = vadd.f32 %v2048_v57, %v2047_v51  ;;  %v1750_v3 = vmul.f32 %v1705_v14, %v1558_v30  ;;  %v1715_v50 = vpop.permute.xlu0 %1714 }
 0x261   :  { %v2050_v10 = vpop.f32.mrf.mxu1 }
 0x262   :  { %v1559_v22 = vmax.f32 %v1527_v26, 0.0  ;;  %v1332_v29 = vadd.f32 %v3276_v35, %v2049_v36  ;;  %v1781_v55 = vadd.f32 %v1780_v59, %v1750_v3 }
 0x263   :  { %v2051_v12 = vpop.f32.mrf.mxu1 }
 0x264   :  { %v1528_v17 = vadd.f32 %v1491_v39, %v1332_v29  ;;  %v2052_v16 = vadd.f32 %v2051_v12, %v2050_v10  ;;  %v1751_v19 = vmul.f32 %v1710_v5, %v1559_v22 }
 0x266   :  { %v1560_v44 = vmax.f32 %v1528_v17, 0.0  ;;  %v1335_v24 = vadd.f32 %v3277_v27, %v2052_v16  ;;  %v1782_v33 = vadd.f32 %v1781_v55, %v1751_v19 }
 0x268   :  { %v1752_v31 = vmul.f32 %v1715_v50, %v1560_v44  ;;  %v1529_v8 = vadd.f32 %v1496_v56, %v1335_v24 }
 0x26a   :  { %v1561_v53 = vmax.f32 %v1529_v8, 0.0  ;;  %v1783_v1 = vadd.f32 %v1782_v33, %v1752_v31 }
 0x26c   :  { %v1753_v18 = vmul.f32 %v1720_v37, %v1561_v53 }
 0x26e   :  { %v1784_v60 = vadd.f32 %v1783_v1, %v1753_v18 }
 0x270   :  { %v1785_v63 = vrot.slane %v1784_v60, 4 }
 0x272   :  { %v1786_v42 = vadd.f32 %v1785_v63, %v1784_v60 }
 0x274   :  { %v1787_v47 = vrot.slane %v1786_v42, 2 }
 0x276   :  { %v1788_v61 = vadd.f32 %v1787_v47, %v1786_v42 }
 0x278   :  { %v1789_v15 = vrot.slane %v1788_v61, 1 }
 0x27a   :  { %v1790_v45 = vadd.f32 %v1789_v15, %v1788_v61 }
 0x27c   :  { %v1793_v46 = vadd.f32 %v1792_v58, %v1790_v45 }
 0x27e   :  { %1794 = vst [vmem:[#allocation3] sm:$0x1] %v1793_v46 }
 0x27f   :  { %2235 = shalt.err (!%p2232_p4)
}
 0x280   :  { %1804 = dma.vmem_to_hbm [thread:$0]  %s1802_s25, 16, %s3195_s5, [#allocation4]  }
 0x281   :  { %2244 = dma.done.wait [#allocation4], 16  }
 0x282   :  { %2245 = vsyncadd [#allocation4], 4294967280 }
 0x283   :  { %1808 = vsyncpa [#allocation4], 1 }

</bundles_post_ra>
